<compile_context>
chip_gen: v6e
topology: v6e:2x2x1
jax: 0.10.0
libtpu: 0.0.40
codegen_flags: <defaults>
</compile_context>

<pallas_src>
import jax
import jax.numpy as jnp
from jax.experimental import pallas as pl
from jax.experimental.pallas import tpu as pltpu

F32 = jnp.float32
KERNEL_SIZE = 3


# ----------------------------- static TCN structure -----------------------------

def _tcn_structure(in_channels, channel_list):
    struct = []
    cin = in_channels
    for i, cout in enumerate(channel_list):
        struct.append({"cin": cin, "cout": cout, "dilation": 2 ** i, "down": cin != cout})
        cin = cout
    return struct


# ------------------------------- fused forward kernel ---------------------------

def _build_forward_kernel(cfg):
    G = cfg["num_graphs"]
    NPG = cfg["nodes_per_graph"]
    F = cfg["pre_leg"]
    L = 3 * F                      # TCN sequence length
    K = cfg["kernel_size"]
    struct = cfg["tcn_struct"]

    def kernel(*refs):
        it = iter(refs)
        a_ref = next(it)                                    # [N, N] normalized adjacency
        x_ref = next(it)                                    # [N, F_in] node features
        gcn = [(next(it), next(it)) for _ in range(3)]      # (W, b[1,F]) x3
        tcn = []
        for blk in struct:
            r = {"w1": next(it), "b1": next(it), "w2": next(it), "b2": next(it)}
            if blk["down"]:
                r["wd"] = next(it)
                r["bd"] = next(it)
            tcn.append(r)
        fc = [(next(it), next(it)) for _ in range(3)]       # (W, b[1,n]) x3
        o_ref = next(it)                                    # [num_tcn_features, num_classes]
        h_ref = next(it)                                    # VMEM scratch [N, F]

        # ---------------- GCN x3: relu(A_hat @ (H @ W) + b); A_hat resident in VMEM -------------
        a = a_ref[...]
        h = x_ref[...]
        for w_r, b_r in gcn:
            hw = jnp.dot(h, w_r[...], preferred_element_type=F32)
            h = jnp.maximum(jnp.dot(a, hw, preferred_element_type=F32) + b_r[...], 0.0)
        h_ref[...] = h      # park in scratch so per-graph node positions can be read strided

        # ------------- structured global mean / max / sum pool (contiguous graphs) --------------
        # node j of graph g lives at row g*NPG + j -> one strided sublane load per node position.
        parts = [h_ref[pl.ds(j, G, NPG), :] for j in range(NPG)]       # each [G, F]
        s = parts[0]
        mx = parts[0]
        for p in parts[1:]:
            s = s + p
            mx = jnp.maximum(mx, p)
        pooled = jnp.concatenate([s * (1.0 / NPG), mx, s], axis=1)     # torch.cat([mean,max,sum],1)

        # -------------------------------- TCN (4 TemporalBlocks) --------------------------------
        def causal_conv(xin, cin, w2d_r, b_r, dilation):
            # im2col: row k*cin + c, col t  =  xin[c, t - (K-1-k)*dilation]  (0 if out of range).
            views = []
            for k in range(K):
                shift = (K - 1 - k) * dilation
                if shift == 0:
                    views.append(xin)
                elif shift >= L:
                    views.append(jnp.zeros((cin, L), F32))
                else:
                    views.append(jnp.concatenate(
                        [jnp.zeros((cin, shift), F32), xin[:, 0:L - shift]], axis=1))
            stacked = jnp.concatenate(views, axis=0)                   # [K*cin, L]
            y = jnp.dot(w2d_r[...], stacked, preferred_element_type=F32) + b_r[...]
            # conv -> chomp -> relu (dropout = identity, eval semantics)
            return jnp.maximum(y, 0.0)

        t = pooled                                                     # [channels=G, length=L]
        for blk, r in zip(struct, tcn):
            d = blk["dilation"]
            h1 = causal_conv(t, blk["cin"], r["w1"], r["b1"], d)
            h2 = causal_conv(h1, blk["cout"], r["w2"], r["b2"], d)
            if blk["down"]:      # 1x1 downsample conv on the residual branch
                res = jnp.dot(r["wd"][...], t, preferred_element_type=F32) + r["bd"][...]
            else:
                res = t
            t = jnp.maximum(h2 + res, 0.0)

        # ------------------------------------ MLP head -------------------------------------------
        out = t                                                        # [num_tcn_features, L]
        for i, (w_r, b_r) in enumerate(fc):
            out = jnp.dot(out, w_r[...], preferred_element_type=F32) + b_r[...]
            if i < 2:
                out = jnp.maximum(out, 0.0)
        o_ref[...] = out                                               # [num_tcn_features, classes]

    return kernel


def build_traffic_forward(cfg):
    kernel = _build_forward_kernel(cfg)
    n_in = 2 + 6 + sum(6 if b["down"] else 4 for b in cfg["tcn_struct"]) + 6
    out_rows = cfg["tcn_struct"][-1]["cout"]        # == num_tcn_features

    call = pl.pallas_call(
        kernel,
        out_shape=jax.ShapeDtypeStruct((out_rows, cfg["num_classes"]), F32),
        in_specs=[pl.BlockSpec(memory_space=pltpu.MemorySpace.VMEM)] * n_in,
        out_specs=pl.BlockSpec(memory_space=pltpu.MemorySpace.VMEM),
        scratch_shapes=[pltpu.VMEM((cfg["n_nodes"], cfg["pre_leg"]), F32)],
    )

    def forward(flat_inputs):
        out = call(*flat_inputs)
        out = out.T                         # [num_classes, num_tcn_features]
        if out.shape[0] == 1:               # torch .squeeze(0)
            out = out[0]
        return out

    return forward


# --------------------------- parameter init & kernel layout ---------------------

def init_params(key, num_node_features, num_tcn_features, num_classes, pre_leg,
                tcn_in_channels, kernel_size=3):
    keys = iter(jax.random.split(key, 64))

    def w(shape, scale=0.1):
        return scale * jax.random.normal(next(keys), shape, dtype=F32)

    p = {}
    p["gcn1_w"] = w((num_node_features, pre_leg)); p["gcn1_b"] = w((pre_leg,))
    p["gcn2_w"] = w((pre_leg, pre_leg));           p["gcn2_b"] = w((pre_leg,))
    p["gcn3_w"] = w((pre_leg, pre_leg));           p["gcn3_b"] = w((pre_leg,))

    # TemporalConvNet(48, [F_tcn]*4, kernel_size=3); weight_norm folded into effective weights.
    blocks = []
    in_ch = tcn_in_channels
    for out_ch in [num_tcn_features] * 4:
        blk = {
            "w1": w((kernel_size, out_ch, in_ch)),  "b1": w((out_ch,)),
            "w2": w((kernel_size, out_ch, out_ch)), "b2": w((out_ch,)),
            "wd": w((out_ch, in_ch)) if in_ch != out_ch else None,
            "bd": w((out_ch,)) if in_ch != out_ch else None,
        }
        blocks.append(blk)
        in_ch = out_ch
    p["tcn_blocks"] = blocks

    p["fc1_w"] = w((pre_leg * 3, 24)); p["fc1_b"] = w((24,))
    p["fc2_w"] = w((24, 12));          p["fc2_b"] = w((12,))
    p["fc3_w"] = w((12, num_classes)); p["fc3_b"] = w((num_classes,))
    return p


def flatten_kernel_inputs(params, x, a_hat, cfg):
    """One-time layout prep: flat input list in kernel order (conv weights -> im2col 2-D form)."""
    K = cfg["kernel_size"]
    ins = [a_hat, x]
    for i in (1, 2, 3):
        ins += [params[f"gcn{i}_w"], params[f"gcn{i}_b"].reshape(1, -1)]
    for blk, bp in zip(cfg["tcn_struct"], params["tcn_blocks"]):
        cin, cout = blk["cin"], blk["cout"]
        w1 = jnp.transpose(bp["w1"], (1, 0, 2)).reshape(cout, K * cin)     # [Cout, K*Cin]
        w2 = jnp.transpose(bp["w2"], (1, 0, 2)).reshape(cout, K * cout)
        ins += [w1, bp["b1"].reshape(-1, 1), w2, bp["b2"].reshape(-1, 1)]
        if blk["down"]:
            ins += [bp["wd"], bp["bd"].reshape(-1, 1)]
    for i in (1, 2, 3):
        ins += [params[f"fc{i}_w"], params[f"fc{i}_b"].reshape(1, -1)]
    return ins


# ------------------------------ graph glue (plain JAX) --------------------------

def gcn_normalized_adjacency(edge_index, num_nodes):
    # D^{-1/2} (A + I) D^{-1/2}, matching PyG gcn_norm (degree over targets incl. self-loop).
    row, col = edge_index
    loop = jnp.arange(num_nodes, dtype=edge_index.dtype)
    row = jnp.concatenate([row, loop])
    col = jnp.concatenate([col, loop])
    deg = jnp.zeros((num_nodes,), F32).at[col].add(1.0)
    dinv = jax.lax.rsqrt(deg)
    vals = dinv[row] * dinv[col]
    return jnp.zeros((num_nodes, num_nodes), F32).at[col, row].add(vals)


# ------------------------------------- main --------------------------------------

if __name__ == "__main__":
    num_node_features = 4
    pre_leg = 8                 # -> TCN sequence length = 3*pre_leg = 24 = fc1 input
    num_tcn_features = 8
    num_classes = 1
    num_graphs = 48             # TemporalConvNet in_channels = 48 == number of graphs
    nodes_per_graph = 4
    n_nodes = num_graphs * nodes_per_graph

    key = jax.random.PRNGKey(0)
    k_x, k_p = jax.random.split(key)
    x = jax.random.normal(k_x, (n_nodes, num_node_features), dtype=F32)

    # Undirected ring inside each graph.
    src, dst = [], []
    for g in range(num_graphs):
        base = g * nodes_per_graph
        for j in range(nodes_per_graph):
            a_, b_ = base + j, base + (j + 1) % nodes_per_graph
            src += [a_, b_]
            dst += [b_, a_]
    edge_index = jnp.array([src, dst], dtype=jnp.int32)
    batch = jnp.repeat(jnp.arange(num_graphs, dtype=jnp.int32), nodes_per_graph)

    a_hat = gcn_normalized_adjacency(edge_index, n_nodes)

    # Structured pooling in the fused kernel assumes contiguous, equal-size graphs (true here).
    # TODO(synk): general ragged `batch` vectors would need the dense-mask pooling path instead.
    assert bool(jnp.all(batch == jnp.repeat(jnp.arange(num_graphs, dtype=jnp.int32),
                                            nodes_per_graph)))

    cfg = {
        "n_nodes": n_nodes, "num_graphs": num_graphs, "nodes_per_graph": nodes_per_graph,
        "pre_leg": pre_leg, "kernel_size": KERNEL_SIZE, "num_classes": num_classes,
        "tcn_struct": _tcn_structure(num_graphs, [num_tcn_features] * 4),
    }

    params = init_params(k_p, num_node_features, num_tcn_features, num_classes, pre_leg,
                         tcn_in_channels=num_graphs, kernel_size=KERNEL_SIZE)
    inputs = flatten_kernel_inputs(params, x, a_hat, cfg)

    forward = build_traffic_forward(cfg)
    out = jax.block_until_ready(forward(inputs))
    assert out.shape == (num_tcn_features,), out.shape
    print("KERNEL_OK")
</pallas_src>

<mosaic_0001>
module attributes {stable_mosaic.version = 11 : i64} {
  func.func @kernel(%arg0: memref<192x192xf32, #tpu.memory_space<vmem>>, %arg1: memref<192x4xf32, #tpu.memory_space<vmem>>, %arg2: memref<4x8xf32, #tpu.memory_space<vmem>>, %arg3: memref<1x8xf32, #tpu.memory_space<vmem>>, %arg4: memref<8x8xf32, #tpu.memory_space<vmem>>, %arg5: memref<1x8xf32, #tpu.memory_space<vmem>>, %arg6: memref<8x8xf32, #tpu.memory_space<vmem>>, %arg7: memref<1x8xf32, #tpu.memory_space<vmem>>, %arg8: memref<8x144xf32, #tpu.memory_space<vmem>>, %arg9: memref<8x1xf32, #tpu.memory_space<vmem>>, %arg10: memref<8x24xf32, #tpu.memory_space<vmem>>, %arg11: memref<8x1xf32, #tpu.memory_space<vmem>>, %arg12: memref<8x48xf32, #tpu.memory_space<vmem>>, %arg13: memref<8x1xf32, #tpu.memory_space<vmem>>, %arg14: memref<8x24xf32, #tpu.memory_space<vmem>>, %arg15: memref<8x1xf32, #tpu.memory_space<vmem>>, %arg16: memref<8x24xf32, #tpu.memory_space<vmem>>, %arg17: memref<8x1xf32, #tpu.memory_space<vmem>>, %arg18: memref<8x24xf32, #tpu.memory_space<vmem>>, %arg19: memref<8x1xf32, #tpu.memory_space<vmem>>, %arg20: memref<8x24xf32, #tpu.memory_space<vmem>>, %arg21: memref<8x1xf32, #tpu.memory_space<vmem>>, %arg22: memref<8x24xf32, #tpu.memory_space<vmem>>, %arg23: memref<8x1xf32, #tpu.memory_space<vmem>>, %arg24: memref<8x24xf32, #tpu.memory_space<vmem>>, %arg25: memref<8x1xf32, #tpu.memory_space<vmem>>, %arg26: memref<24x24xf32, #tpu.memory_space<vmem>>, %arg27: memref<1x24xf32, #tpu.memory_space<vmem>>, %arg28: memref<24x12xf32, #tpu.memory_space<vmem>>, %arg29: memref<1x12xf32, #tpu.memory_space<vmem>>, %arg30: memref<12x1xf32, #tpu.memory_space<vmem>>, %arg31: memref<1x1xf32, #tpu.memory_space<vmem>>, %arg32: memref<8x1xf32, #tpu.memory_space<vmem>>, %arg33: memref<192x8xf32, #tpu.memory_space<vmem>>) attributes {dimension_semantics = [], scalar_prefetch = 0 : i64, scratch_operands = 1 : i64, tpu.core_type = #tpu.core_type<tc>} {
    %c0 = arith.constant 0 : index
    %c0_0 = arith.constant 0 : index
    %0 = vector.load %arg0[%c0, %c0_0] : memref<192x192xf32, #tpu.memory_space<vmem>>, vector<192x192xf32>
    %c0_1 = arith.constant 0 : index
    %c0_2 = arith.constant 0 : index
    %1 = vector.load %arg1[%c0_1, %c0_2] : memref<192x4xf32, #tpu.memory_space<vmem>>, vector<192x4xf32>
    %c0_3 = arith.constant 0 : index
    %c0_4 = arith.constant 0 : index
    %2 = vector.load %arg2[%c0_3, %c0_4] : memref<4x8xf32, #tpu.memory_space<vmem>>, vector<4x8xf32>
    %cst = arith.constant dense<0.000000e+00> : vector<192x8xf32>
    %3 = tpu.matmul %1, %2, %cst {dimension_numbers = #tpu.dot_dimension_numbers<[1], [0], [0], [1], [0, 0, 1, 1], [], []>} : vector<192x4xf32>, vector<4x8xf32>, vector<192x8xf32> -> vector<192x8xf32>
    %cst_5 = arith.constant dense<0.000000e+00> : vector<192x8xf32>
    %4 = tpu.matmul %0, %3, %cst_5 {dimension_numbers = #tpu.dot_dimension_numbers<[1], [0], [0], [1], [0, 0, 1, 1], [], []>} : vector<192x192xf32>, vector<192x8xf32>, vector<192x8xf32> -> vector<192x8xf32>
    %c0_6 = arith.constant 0 : index
    %c0_7 = arith.constant 0 : index
    %5 = vector.load %arg3[%c0_6, %c0_7] : memref<1x8xf32, #tpu.memory_space<vmem>>, vector<1x8xf32>
    %6 = vector.broadcast %5 : vector<1x8xf32> to vector<192x8xf32>
    %7 = arith.addf %4, %6 : vector<192x8xf32>
    %cst_8 = arith.constant 0.000000e+00 : f32
    %8 = vector.broadcast %cst_8 : f32 to vector<192x8xf32>
    %9 = arith.maximumf %7, %8 : vector<192x8xf32>
    %c0_9 = arith.constant 0 : index
    %c0_10 = arith.constant 0 : index
    %10 = vector.load %arg4[%c0_9, %c0_10] : memref<8x8xf32, #tpu.memory_space<vmem>>, vector<8x8xf32>
    %cst_11 = arith.constant dense<0.000000e+00> : vector<192x8xf32>
    %11 = tpu.matmul %9, %10, %cst_11 {dimension_numbers = #tpu.dot_dimension_numbers<[1], [0], [0], [1], [0, 0, 1, 1], [], []>} : vector<192x8xf32>, vector<8x8xf32>, vector<192x8xf32> -> vector<192x8xf32>
    %cst_12 = arith.constant dense<0.000000e+00> : vector<192x8xf32>
    %12 = tpu.matmul %0, %11, %cst_12 {dimension_numbers = #tpu.dot_dimension_numbers<[1], [0], [0], [1], [0, 0, 1, 1], [], []>} : vector<192x192xf32>, vector<192x8xf32>, vector<192x8xf32> -> vector<192x8xf32>
    %c0_13 = arith.constant 0 : index
    %c0_14 = arith.constant 0 : index
    %13 = vector.load %arg5[%c0_13, %c0_14] : memref<1x8xf32, #tpu.memory_space<vmem>>, vector<1x8xf32>
    %14 = vector.broadcast %13 : vector<1x8xf32> to vector<192x8xf32>
    %15 = arith.addf %12, %14 : vector<192x8xf32>
    %cst_15 = arith.constant 0.000000e+00 : f32
    %16 = vector.broadcast %cst_15 : f32 to vector<192x8xf32>
    %17 = arith.maximumf %15, %16 : vector<192x8xf32>
    %c0_16 = arith.constant 0 : index
    %c0_17 = arith.constant 0 : index
    %18 = vector.load %arg6[%c0_16, %c0_17] : memref<8x8xf32, #tpu.memory_space<vmem>>, vector<8x8xf32>
    %cst_18 = arith.constant dense<0.000000e+00> : vector<192x8xf32>
    %19 = tpu.matmul %17, %18, %cst_18 {dimension_numbers = #tpu.dot_dimension_numbers<[1], [0], [0], [1], [0, 0, 1, 1], [], []>} : vector<192x8xf32>, vector<8x8xf32>, vector<192x8xf32> -> vector<192x8xf32>
    %cst_19 = arith.constant dense<0.000000e+00> : vector<192x8xf32>
    %20 = tpu.matmul %0, %19, %cst_19 {dimension_numbers = #tpu.dot_dimension_numbers<[1], [0], [0], [1], [0, 0, 1, 1], [], []>} : vector<192x192xf32>, vector<192x8xf32>, vector<192x8xf32> -> vector<192x8xf32>
    %c0_20 = arith.constant 0 : index
    %c0_21 = arith.constant 0 : index
    %21 = vector.load %arg7[%c0_20, %c0_21] : memref<1x8xf32, #tpu.memory_space<vmem>>, vector<1x8xf32>
    %22 = vector.broadcast %21 : vector<1x8xf32> to vector<192x8xf32>
    %23 = arith.addf %20, %22 : vector<192x8xf32>
    %cst_22 = arith.constant 0.000000e+00 : f32
    %24 = vector.broadcast %cst_22 : f32 to vector<192x8xf32>
    %25 = arith.maximumf %23, %24 : vector<192x8xf32>
    %c0_23 = arith.constant 0 : index
    %c0_24 = arith.constant 0 : index
    %26 = vector.load %arg33[%c0_23, %c0_24] : memref<192x8xf32, #tpu.memory_space<vmem>>, vector<192x8xf32>
    tpu.vector_store %arg33[%c0_23, %c0_24], %25 {strides = array<i32>} : memref<192x8xf32, #tpu.memory_space<vmem>>, vector<192x8xf32>,
    %c0_25 = arith.constant 0 : index
    %c0_26 = arith.constant 0 : index
    %27 = tpu.strided_load %arg33[%c0_25, %c0_26] {strides = array<i32: 4, 1>} : memref<192x8xf32, #tpu.memory_space<vmem>>, vector<48x8xf32>
    %c1 = arith.constant 1 : index
    %c0_27 = arith.constant 0 : index
    %28 = tpu.strided_load %arg33[%c1, %c0_27] {strides = array<i32: 4, 1>} : memref<192x8xf32, #tpu.memory_space<vmem>>, vector<48x8xf32>
    %c2 = arith.constant 2 : index
    %c0_28 = arith.constant 0 : index
    %29 = tpu.strided_load %arg33[%c2, %c0_28] {strides = array<i32: 4, 1>} : memref<192x8xf32, #tpu.memory_space<vmem>>, vector<48x8xf32>
    %c3 = arith.constant 3 : index
    %c0_29 = arith.constant 0 : index
    %30 = tpu.strided_load %arg33[%c3, %c0_29] {strides = array<i32: 4, 1>} : memref<192x8xf32, #tpu.memory_space<vmem>>, vector<48x8xf32>
    %31 = arith.addf %27, %28 : vector<48x8xf32>
    %32 = arith.maximumf %27, %28 : vector<48x8xf32>
    %33 = arith.addf %31, %29 : vector<48x8xf32>
    %34 = arith.maximumf %32, %29 : vector<48x8xf32>
    %35 = arith.addf %33, %30 : vector<48x8xf32>
    %36 = arith.maximumf %34, %30 : vector<48x8xf32>
    %cst_30 = arith.constant 2.500000e-01 : f32
    %37 = vector.broadcast %cst_30 : f32 to vector<48x8xf32>
    %38 = arith.mulf %35, %37 : vector<48x8xf32>
    %39 = tpu.concatenate %38, %36, %35 in 1 : vector<48x8xf32>, vector<48x8xf32>, vector<48x8xf32> -> vector<48x24xf32>
    %cst_31 = arith.constant 0.000000e+00 : f32
    %40 = vector.broadcast %cst_31 : f32 to vector<48x2xf32>
    %41 = vector.extract_strided_slice %39 {offsets = [0, 0], sizes = [48, 22], strides = [1, 1]} : vector<48x24xf32> to vector<48x22xf32>
    %42 = tpu.concatenate %40, %41 in 1 : vector<48x2xf32>, vector<48x22xf32> -> vector<48x24xf32>
    %cst_32 = arith.constant 0.000000e+00 : f32
    %43 = vector.broadcast %cst_32 : f32 to vector<48x1xf32>
    %44 = vector.extract_strided_slice %39 {offsets = [0, 0], sizes = [48, 23], strides = [1, 1]} : vector<48x24xf32> to vector<48x23xf32>
    %45 = tpu.concatenate %43, %44 in 1 : vector<48x1xf32>, vector<48x23xf32> -> vector<48x24xf32>
    %46 = tpu.concatenate %42, %45, %39 in 0 : vector<48x24xf32>, vector<48x24xf32>, vector<48x24xf32> -> vector<144x24xf32>
    %c0_33 = arith.constant 0 : index
    %c0_34 = arith.constant 0 : index
    %47 = vector.load %arg8[%c0_33, %c0_34] : memref<8x144xf32, #tpu.memory_space<vmem>>, vector<8x144xf32>
    %cst_35 = arith.constant dense<0.000000e+00> : vector<8x24xf32>
    %48 = tpu.matmul %47, %46, %cst_35 {dimension_numbers = #tpu.dot_dimension_numbers<[1], [0], [0], [1], [0, 0, 1, 1], [], []>} : vector<8x144xf32>, vector<144x24xf32>, vector<8x24xf32> -> vector<8x24xf32>
    %c0_36 = arith.constant 0 : index
    %c0_37 = arith.constant 0 : index
    %49 = vector.load %arg9[%c0_36, %c0_37] : memref<8x1xf32, #tpu.memory_space<vmem>>, vector<8x1xf32>
    %50 = vector.broadcast %49 : vector<8x1xf32> to vector<8x24xf32>
    %51 = arith.addf %48, %50 : vector<8x24xf32>
    %cst_38 = arith.constant 0.000000e+00 : f32
    %52 = vector.broadcast %cst_38 : f32 to vector<8x24xf32>
    %53 = arith.maximumf %51, %52 : vector<8x24xf32>
    %cst_39 = arith.constant 0.000000e+00 : f32
    %54 = vector.broadcast %cst_39 : f32 to vector<8x2xf32>
    %55 = vector.extract_strided_slice %53 {offsets = [0, 0], sizes = [8, 22], strides = [1, 1]} : vector<8x24xf32> to vector<8x22xf32>
    %56 = tpu.concatenate %54, %55 in 1 : vector<8x2xf32>, vector<8x22xf32> -> vector<8x24xf32>
    %cst_40 = arith.constant 0.000000e+00 : f32
    %57 = vector.broadcast %cst_40 : f32 to vector<8x1xf32>
    %58 = vector.extract_strided_slice %53 {offsets = [0, 0], sizes = [8, 23], strides = [1, 1]} : vector<8x24xf32> to vector<8x23xf32>
    %59 = tpu.concatenate %57, %58 in 1 : vector<8x1xf32>, vector<8x23xf32> -> vector<8x24xf32>
    %60 = tpu.concatenate %56, %59, %53 in 0 : vector<8x24xf32>, vector<8x24xf32>, vector<8x24xf32> -> vector<24x24xf32>
    %c0_41 = arith.constant 0 : index
    %c0_42 = arith.constant 0 : index
    %61 = vector.load %arg10[%c0_41, %c0_42] : memref<8x24xf32, #tpu.memory_space<vmem>>, vector<8x24xf32>
    %cst_43 = arith.constant dense<0.000000e+00> : vector<8x24xf32>
    %62 = tpu.matmul %61, %60, %cst_43 {dimension_numbers = #tpu.dot_dimension_numbers<[1], [0], [0], [1], [0, 0, 1, 1], [], []>} : vector<8x24xf32>, vector<24x24xf32>, vector<8x24xf32> -> vector<8x24xf32>
    %c0_44 = arith.constant 0 : index
    %c0_45 = arith.constant 0 : index
    %63 = vector.load %arg11[%c0_44, %c0_45] : memref<8x1xf32, #tpu.memory_space<vmem>>, vector<8x1xf32>
    %64 = vector.broadcast %63 : vector<8x1xf32> to vector<8x24xf32>
    %65 = arith.addf %62, %64 : vector<8x24xf32>
    %cst_46 = arith.constant 0.000000e+00 : f32
    %66 = vector.broadcast %cst_46 : f32 to vector<8x24xf32>
    %67 = arith.maximumf %65, %66 : vector<8x24xf32>
    %c0_47 = arith.constant 0 : index
    %c0_48 = arith.constant 0 : index
    %68 = vector.load %arg12[%c0_47, %c0_48] : memref<8x48xf32, #tpu.memory_space<vmem>>, vector<8x48xf32>
    %cst_49 = arith.constant dense<0.000000e+00> : vector<8x24xf32>
    %69 = tpu.matmul %68, %39, %cst_49 {dimension_numbers = #tpu.dot_dimension_numbers<[1], [0], [0], [1], [0, 0, 1, 1], [], []>} : vector<8x48xf32>, vector<48x24xf32>, vector<8x24xf32> -> vector<8x24xf32>
    %c0_50 = arith.constant 0 : index
    %c0_51 = arith.constant 0 : index
    %70 = vector.load %arg13[%c0_50, %c0_51] : memref<8x1xf32, #tpu.memory_space<vmem>>, vector<8x1xf32>
    %71 = vector.broadcast %70 : vector<8x1xf32> to vector<8x24xf32>
    %72 = arith.addf %69, %71 : vector<8x24xf32>
    %73 = arith.addf %67, %72 : vector<8x24xf32>
    %cst_52 = arith.constant 0.000000e+00 : f32
    %74 = vector.broadcast %cst_52 : f32 to vector<8x24xf32>
    %75 = arith.maximumf %73, %74 : vector<8x24xf32>
    %cst_53 = arith.constant 0.000000e+00 : f32
    %76 = vector.broadcast %cst_53 : f32 to vector<8x4xf32>
    %77 = vector.extract_strided_slice %75 {offsets = [0, 0], sizes = [8, 20], strides = [1, 1]} : vector<8x24xf32> to vector<8x20xf32>
    %78 = tpu.concatenate %76, %77 in 1 : vector<8x4xf32>, vector<8x20xf32> -> vector<8x24xf32>
    %cst_54 = arith.constant 0.000000e+00 : f32
    %79 = vector.broadcast %cst_54 : f32 to vector<8x2xf32>
    %80 = vector.extract_strided_slice %75 {offsets = [0, 0], sizes = [8, 22], strides = [1, 1]} : vector<8x24xf32> to vector<8x22xf32>
    %81 = tpu.concatenate %79, %80 in 1 : vector<8x2xf32>, vector<8x22xf32> -> vector<8x24xf32>
    %82 = tpu.concatenate %78, %81, %75 in 0 : vector<8x24xf32>, vector<8x24xf32>, vector<8x24xf32> -> vector<24x24xf32>
    %c0_55 = arith.constant 0 : index
    %c0_56 = arith.constant 0 : index
    %83 = vector.load %arg14[%c0_55, %c0_56] : memref<8x24xf32, #tpu.memory_space<vmem>>, vector<8x24xf32>
    %cst_57 = arith.constant dense<0.000000e+00> : vector<8x24xf32>
    %84 = tpu.matmul %83, %82, %cst_57 {dimension_numbers = #tpu.dot_dimension_numbers<[1], [0], [0], [1], [0, 0, 1, 1], [], []>} : vector<8x24xf32>, vector<24x24xf32>, vector<8x24xf32> -> vector<8x24xf32>
    %c0_58 = arith.constant 0 : index
    %c0_59 = arith.constant 0 : index
    %85 = vector.load %arg15[%c0_58, %c0_59] : memref<8x1xf32, #tpu.memory_space<vmem>>, vector<8x1xf32>
    %86 = vector.broadcast %85 : vector<8x1xf32> to vector<8x24xf32>
    %87 = arith.addf %84, %86 : vector<8x24xf32>
    %cst_60 = arith.constant 0.000000e+00 : f32
    %88 = vector.broadcast %cst_60 : f32 to vector<8x24xf32>
    %89 = arith.maximumf %87, %88 : vector<8x24xf32>
    %cst_61 = arith.constant 0.000000e+00 : f32
    %90 = vector.broadcast %cst_61 : f32 to vector<8x4xf32>
    %91 = vector.extract_strided_slice %89 {offsets = [0, 0], sizes = [8, 20], strides = [1, 1]} : vector<8x24xf32> to vector<8x20xf32>
    %92 = tpu.concatenate %90, %91 in 1 : vector<8x4xf32>, vector<8x20xf32> -> vector<8x24xf32>
    %cst_62 = arith.constant 0.000000e+00 : f32
    %93 = vector.broadcast %cst_62 : f32 to vector<8x2xf32>
    %94 = vector.extract_strided_slice %89 {offsets = [0, 0], sizes = [8, 22], strides = [1, 1]} : vector<8x24xf32> to vector<8x22xf32>
    %95 = tpu.concatenate %93, %94 in 1 : vector<8x2xf32>, vector<8x22xf32> -> vector<8x24xf32>
    %96 = tpu.concatenate %92, %95, %89 in 0 : vector<8x24xf32>, vector<8x24xf32>, vector<8x24xf32> -> vector<24x24xf32>
    %c0_63 = arith.constant 0 : index
    %c0_64 = arith.constant 0 : index
    %97 = vector.load %arg16[%c0_63, %c0_64] : memref<8x24xf32, #tpu.memory_space<vmem>>, vector<8x24xf32>
    %cst_65 = arith.constant dense<0.000000e+00> : vector<8x24xf32>
    %98 = tpu.matmul %97, %96, %cst_65 {dimension_numbers = #tpu.dot_dimension_numbers<[1], [0], [0], [1], [0, 0, 1, 1], [], []>} : vector<8x24xf32>, vector<24x24xf32>, vector<8x24xf32> -> vector<8x24xf32>
    %c0_66 = arith.constant 0 : index
    %c0_67 = arith.constant 0 : index
    %99 = vector.load %arg17[%c0_66, %c0_67] : memref<8x1xf32, #tpu.memory_space<vmem>>, vector<8x1xf32>
    %100 = vector.broadcast %99 : vector<8x1xf32> to vector<8x24xf32>
    %101 = arith.addf %98, %100 : vector<8x24xf32>
    %cst_68 = arith.constant 0.000000e+00 : f32
    %102 = vector.broadcast %cst_68 : f32 to vector<8x24xf32>
    %103 = arith.maximumf %101, %102 : vector<8x24xf32>
    %104 = arith.addf %103, %75 : vector<8x24xf32>
    %cst_69 = arith.constant 0.000000e+00 : f32
    %105 = vector.broadcast %cst_69 : f32 to vector<8x24xf32>
    %106 = arith.maximumf %104, %105 : vector<8x24xf32>
    %cst_70 = arith.constant 0.000000e+00 : f32
    %107 = vector.broadcast %cst_70 : f32 to vector<8x8xf32>
    %108 = vector.extract_strided_slice %106 {offsets = [0, 0], sizes = [8, 16], strides = [1, 1]} : vector<8x24xf32> to vector<8x16xf32>
    %109 = tpu.concatenate %107, %108 in 1 : vector<8x8xf32>, vector<8x16xf32> -> vector<8x24xf32>
    %cst_71 = arith.constant 0.000000e+00 : f32
    %110 = vector.broadcast %cst_71 : f32 to vector<8x4xf32>
    %111 = vector.extract_strided_slice %106 {offsets = [0, 0], sizes = [8, 20], strides = [1, 1]} : vector<8x24xf32> to vector<8x20xf32>
    %112 = tpu.concatenate %110, %111 in 1 : vector<8x4xf32>, vector<8x20xf32> -> vector<8x24xf32>
    %113 = tpu.concatenate %109, %112, %106 in 0 : vector<8x24xf32>, vector<8x24xf32>, vector<8x24xf32> -> vector<24x24xf32>
    %c0_72 = arith.constant 0 : index
    %c0_73 = arith.constant 0 : index
    %114 = vector.load %arg18[%c0_72, %c0_73] : memref<8x24xf32, #tpu.memory_space<vmem>>, vector<8x24xf32>
    %cst_74 = arith.constant dense<0.000000e+00> : vector<8x24xf32>
    %115 = tpu.matmul %114, %113, %cst_74 {dimension_numbers = #tpu.dot_dimension_numbers<[1], [0], [0], [1], [0, 0, 1, 1], [], []>} : vector<8x24xf32>, vector<24x24xf32>, vector<8x24xf32> -> vector<8x24xf32>
    %c0_75 = arith.constant 0 : index
    %c0_76 = arith.constant 0 : index
    %116 = vector.load %arg19[%c0_75, %c0_76] : memref<8x1xf32, #tpu.memory_space<vmem>>, vector<8x1xf32>
    %117 = vector.broadcast %116 : vector<8x1xf32> to vector<8x24xf32>
    %118 = arith.addf %115, %117 : vector<8x24xf32>
    %cst_77 = arith.constant 0.000000e+00 : f32
    %119 = vector.broadcast %cst_77 : f32 to vector<8x24xf32>
    %120 = arith.maximumf %118, %119 : vector<8x24xf32>
    %cst_78 = arith.constant 0.000000e+00 : f32
    %121 = vector.broadcast %cst_78 : f32 to vector<8x8xf32>
    %122 = vector.extract_strided_slice %120 {offsets = [0, 0], sizes = [8, 16], strides = [1, 1]} : vector<8x24xf32> to vector<8x16xf32>
    %123 = tpu.concatenate %121, %122 in 1 : vector<8x8xf32>, vector<8x16xf32> -> vector<8x24xf32>
    %cst_79 = arith.constant 0.000000e+00 : f32
    %124 = vector.broadcast %cst_79 : f32 to vector<8x4xf32>
    %125 = vector.extract_strided_slice %120 {offsets = [0, 0], sizes = [8, 20], strides = [1, 1]} : vector<8x24xf32> to vector<8x20xf32>
    %126 = tpu.concatenate %124, %125 in 1 : vector<8x4xf32>, vector<8x20xf32> -> vector<8x24xf32>
    %127 = tpu.concatenate %123, %126, %120 in 0 : vector<8x24xf32>, vector<8x24xf32>, vector<8x24xf32> -> vector<24x24xf32>
    %c0_80 = arith.constant 0 : index
    %c0_81 = arith.constant 0 : index
    %128 = vector.load %arg20[%c0_80, %c0_81] : memref<8x24xf32, #tpu.memory_space<vmem>>, vector<8x24xf32>
    %cst_82 = arith.constant dense<0.000000e+00> : vector<8x24xf32>
    %129 = tpu.matmul %128, %127, %cst_82 {dimension_numbers = #tpu.dot_dimension_numbers<[1], [0], [0], [1], [0, 0, 1, 1], [], []>} : vector<8x24xf32>, vector<24x24xf32>, vector<8x24xf32> -> vector<8x24xf32>
    %c0_83 = arith.constant 0 : index
    %c0_84 = arith.constant 0 : index
    %130 = vector.load %arg21[%c0_83, %c0_84] : memref<8x1xf32, #tpu.memory_space<vmem>>, vector<8x1xf32>
    %131 = vector.broadcast %130 : vector<8x1xf32> to vector<8x24xf32>
    %132 = arith.addf %129, %131 : vector<8x24xf32>
    %cst_85 = arith.constant 0.000000e+00 : f32
    %133 = vector.broadcast %cst_85 : f32 to vector<8x24xf32>
    %134 = arith.maximumf %132, %133 : vector<8x24xf32>
    %135 = arith.addf %134, %106 : vector<8x24xf32>
    %cst_86 = arith.constant 0.000000e+00 : f32
    %136 = vector.broadcast %cst_86 : f32 to vector<8x24xf32>
    %137 = arith.maximumf %135, %136 : vector<8x24xf32>
    %cst_87 = arith.constant 0.000000e+00 : f32
    %138 = vector.broadcast %cst_87 : f32 to vector<8x16xf32>
    %139 = vector.extract_strided_slice %137 {offsets = [0, 0], sizes = [8, 8], strides = [1, 1]} : vector<8x24xf32> to vector<8x8xf32>
    %140 = tpu.concatenate %138, %139 in 1 : vector<8x16xf32>, vector<8x8xf32> -> vector<8x24xf32>
    %cst_88 = arith.constant 0.000000e+00 : f32
    %141 = vector.broadcast %cst_88 : f32 to vector<8x8xf32>
    %142 = vector.extract_strided_slice %137 {offsets = [0, 0], sizes = [8, 16], strides = [1, 1]} : vector<8x24xf32> to vector<8x16xf32>
    %143 = tpu.concatenate %141, %142 in 1 : vector<8x8xf32>, vector<8x16xf32> -> vector<8x24xf32>
    %144 = tpu.concatenate %140, %143, %137 in 0 : vector<8x24xf32>, vector<8x24xf32>, vector<8x24xf32> -> vector<24x24xf32>
    %c0_89 = arith.constant 0 : index
    %c0_90 = arith.constant 0 : index
    %145 = vector.load %arg22[%c0_89, %c0_90] : memref<8x24xf32, #tpu.memory_space<vmem>>, vector<8x24xf32>
    %cst_91 = arith.constant dense<0.000000e+00> : vector<8x24xf32>
    %146 = tpu.matmul %145, %144, %cst_91 {dimension_numbers = #tpu.dot_dimension_numbers<[1], [0], [0], [1], [0, 0, 1, 1], [], []>} : vector<8x24xf32>, vector<24x24xf32>, vector<8x24xf32> -> vector<8x24xf32>
    %c0_92 = arith.constant 0 : index
    %c0_93 = arith.constant 0 : index
    %147 = vector.load %arg23[%c0_92, %c0_93] : memref<8x1xf32, #tpu.memory_space<vmem>>, vector<8x1xf32>
    %148 = vector.broadcast %147 : vector<8x1xf32> to vector<8x24xf32>
    %149 = arith.addf %146, %148 : vector<8x24xf32>
    %cst_94 = arith.constant 0.000000e+00 : f32
    %150 = vector.broadcast %cst_94 : f32 to vector<8x24xf32>
    %151 = arith.maximumf %149, %150 : vector<8x24xf32>
    %cst_95 = arith.constant 0.000000e+00 : f32
    %152 = vector.broadcast %cst_95 : f32 to vector<8x16xf32>
    %153 = vector.extract_strided_slice %151 {offsets = [0, 0], sizes = [8, 8], strides = [1, 1]} : vector<8x24xf32> to vector<8x8xf32>
    %154 = tpu.concatenate %152, %153 in 1 : vector<8x16xf32>, vector<8x8xf32> -> vector<8x24xf32>
    %cst_96 = arith.constant 0.000000e+00 : f32
    %155 = vector.broadcast %cst_96 : f32 to vector<8x8xf32>
    %156 = vector.extract_strided_slice %151 {offsets = [0, 0], sizes = [8, 16], strides = [1, 1]} : vector<8x24xf32> to vector<8x16xf32>
    %157 = tpu.concatenate %155, %156 in 1 : vector<8x8xf32>, vector<8x16xf32> -> vector<8x24xf32>
    %158 = tpu.concatenate %154, %157, %151 in 0 : vector<8x24xf32>, vector<8x24xf32>, vector<8x24xf32> -> vector<24x24xf32>
    %c0_97 = arith.constant 0 : index
    %c0_98 = arith.constant 0 : index
    %159 = vector.load %arg24[%c0_97, %c0_98] : memref<8x24xf32, #tpu.memory_space<vmem>>, vector<8x24xf32>
    %cst_99 = arith.constant dense<0.000000e+00> : vector<8x24xf32>
    %160 = tpu.matmul %159, %158, %cst_99 {dimension_numbers = #tpu.dot_dimension_numbers<[1], [0], [0], [1], [0, 0, 1, 1], [], []>} : vector<8x24xf32>, vector<24x24xf32>, vector<8x24xf32> -> vector<8x24xf32>
    %c0_100 = arith.constant 0 : index
    %c0_101 = arith.constant 0 : index
    %161 = vector.load %arg25[%c0_100, %c0_101] : memref<8x1xf32, #tpu.memory_space<vmem>>, vector<8x1xf32>
    %162 = vector.broadcast %161 : vector<8x1xf32> to vector<8x24xf32>
    %163 = arith.addf %160, %162 : vector<8x24xf32>
    %cst_102 = arith.constant 0.000000e+00 : f32
    %164 = vector.broadcast %cst_102 : f32 to vector<8x24xf32>
    %165 = arith.maximumf %163, %164 : vector<8x24xf32>
    %166 = arith.addf %165, %137 : vector<8x24xf32>
    %cst_103 = arith.constant 0.000000e+00 : f32
    %167 = vector.broadcast %cst_103 : f32 to vector<8x24xf32>
    %168 = arith.maximumf %166, %167 : vector<8x24xf32>
    %c0_104 = arith.constant 0 : index
    %c0_105 = arith.constant 0 : index
    %169 = vector.load %arg26[%c0_104, %c0_105] : memref<24x24xf32, #tpu.memory_space<vmem>>, vector<24x24xf32>
    %cst_106 = arith.constant dense<0.000000e+00> : vector<8x24xf32>
    %170 = tpu.matmul %168, %169, %cst_106 {dimension_numbers = #tpu.dot_dimension_numbers<[1], [0], [0], [1], [0, 0, 1, 1], [], []>} : vector<8x24xf32>, vector<24x24xf32>, vector<8x24xf32> -> vector<8x24xf32>
    %c0_107 = arith.constant 0 : index
    %c0_108 = arith.constant 0 : index
    %171 = vector.load %arg27[%c0_107, %c0_108] : memref<1x24xf32, #tpu.memory_space<vmem>>, vector<1x24xf32>
    %172 = vector.broadcast %171 : vector<1x24xf32> to vector<8x24xf32>
    %173 = arith.addf %170, %172 : vector<8x24xf32>
    %cst_109 = arith.constant 0.000000e+00 : f32
    %174 = vector.broadcast %cst_109 : f32 to vector<8x24xf32>
    %175 = arith.maximumf %173, %174 : vector<8x24xf32>
    %c0_110 = arith.constant 0 : index
    %c0_111 = arith.constant 0 : index
    %176 = vector.load %arg28[%c0_110, %c0_111] : memref<24x12xf32, #tpu.memory_space<vmem>>, vector<24x12xf32>
    %cst_112 = arith.constant dense<0.000000e+00> : vector<8x12xf32>
    %177 = tpu.matmul %175, %176, %cst_112 {dimension_numbers = #tpu.dot_dimension_numbers<[1], [0], [0], [1], [0, 0, 1, 1], [], []>} : vector<8x24xf32>, vector<24x12xf32>, vector<8x12xf32> -> vector<8x12xf32>
    %c0_113 = arith.constant 0 : index
    %c0_114 = arith.constant 0 : index
    %178 = vector.load %arg29[%c0_113, %c0_114] : memref<1x12xf32, #tpu.memory_space<vmem>>, vector<1x12xf32>
    %179 = vector.broadcast %178 : vector<1x12xf32> to vector<8x12xf32>
    %180 = arith.addf %177, %179 : vector<8x12xf32>
    %cst_115 = arith.constant 0.000000e+00 : f32
    %181 = vector.broadcast %cst_115 : f32 to vector<8x12xf32>
    %182 = arith.maximumf %180, %181 : vector<8x12xf32>
    %c0_116 = arith.constant 0 : index
    %c0_117 = arith.constant 0 : index
    %183 = vector.load %arg30[%c0_116, %c0_117] : memref<12x1xf32, #tpu.memory_space<vmem>>, vector<12x1xf32>
    %cst_118 = arith.constant dense<0.000000e+00> : vector<8x1xf32>
    %184 = tpu.matmul %182, %183, %cst_118 {dimension_numbers = #tpu.dot_dimension_numbers<[1], [0], [0], [1], [0, 0, 1, 1], [], []>} : vector<8x12xf32>, vector<12x1xf32>, vector<8x1xf32> -> vector<8x1xf32>
    %c0_119 = arith.constant 0 : index
    %c0_120 = arith.constant 0 : index
    %185 = vector.load %arg31[%c0_119, %c0_120] : memref<1x1xf32, #tpu.memory_space<vmem>>, vector<1x1xf32>
    %186 = vector.broadcast %185 : vector<1x1xf32> to vector<8x1xf32>
    %187 = arith.addf %184, %186 : vector<8x1xf32>
    %c0_121 = arith.constant 0 : index
    %c0_122 = arith.constant 0 : index
    %188 = vector.load %arg32[%c0_121, %c0_122] : memref<8x1xf32, #tpu.memory_space<vmem>>, vector<8x1xf32>
    tpu.vector_store %arg32[%c0_121, %c0_122], %187 {strides = array<i32>} : memref<8x1xf32, #tpu.memory_space<vmem>>, vector<8x1xf32>,
    return
  }
}

</mosaic_0001>

<bundles_post_ra>
// kernel: tpu_custom_call.1
= control target key start
LH: loop header
LB: loop body
LE: loop exit
PB: predicated region body
PF: predicated region fallthrough
CT: control target
= control target key end

     0   :  { %s3742_s6 = smov 1   ;;  %s3743_s10 = smov 2   ;;  %s4848_s0 = inlined_call_operand.smem [shape: u32[33], index: -1, kind: input, shape index: {}] }
   0x1   :  { %s3792_s5 = sld [smem:[%s4848_s0]]   ;;  %s3744_s14 = smov 3  }
   0x2   :  { %s3797_s9 = sld [smem:[%s4848_s0 + %s3742_s6]]   ;;  %s3745_s18 = smov 4  }
   0x3   :  { %s3802_s13 = sld [smem:[%s4848_s0 + %s3743_s10]]   ;;  %s3746_s22 = smov 5  }
   0x4   :  { %s3807_s17 = sld [smem:[%s4848_s0 + %s3744_s14]]   ;;  %s3747_s26 = smov 6  }
   0x5   :  { %s3812_s21 = sld [smem:[%s4848_s0 + %s3745_s18]]   ;;  %s3748_s30 = smov 7  }
   0x6   :  { %s3817_s25 = sld [smem:[%s4848_s0 + %s3746_s22]]   ;;  %s3749_s4 = smov 8  }
   0x7   :  { %s3822_s29 = sld [smem:[%s4848_s0 + %s3747_s26]]   ;;  %s3750_s10 = smov 9  }
   0x8   :  { %s3827_s3 = sld [smem:[%s4848_s0 + %s3748_s30]]   ;;  %s3751_s15 = smov 10  }
   0x9   :  { %s3832_s8 = sld [smem:[%s4848_s0 + %s3749_s4]]   ;;  %s3752_s20 = smov 11  }
   0xa   :  { %s3837_s14 = sld [smem:[%s4848_s0 + %s3750_s10]]   ;;  %s3753_s26 = smov 12  }
   0xb   :  { %s3842_s19 = sld [smem:[%s4848_s0 + %s3751_s15]]   ;;  %s3754_s1 = smov 13  }
   0xc   :  { %s3847_s24 = sld [smem:[%s4848_s0 + %s3752_s20]]   ;;  %s3755_s7 = smov 14  }
   0xd   :  { %s3852_s30 = sld [smem:[%s4848_s0 + %s3753_s26]]   ;;  %s3756_s15 = smov 15  }
   0xe   :  { %s3857_s6 = sld [smem:[%s4848_s0 + %s3754_s1]]   ;;  %s3757_s22 = smov 16  }
   0xf   :  { %s3862_s12 = sld [smem:[%s4848_s0 + %s3755_s7]]   ;;  %s3758_s28 = smov 17  }
  0x10   :  { %s3867_s20 = sld [smem:[%s4848_s0 + %s3756_s15]]   ;;  %s3759_s7 = smov 18  }
  0x11   :  { %s3872_s27 = sld [smem:[%s4848_s0 + %s3757_s22]]   ;;  %s3760_s15 = smov 19  }
  0x12   :  { %s3877_s4 = sld [smem:[%s4848_s0 + %s3758_s28]]   ;;  %s3761_s22 = smov 20  }
  0x13   :  { %s3762_s28 = smov 21   ;;  %s3773_s23 = smov 32  }
  0x15   :  { %4855 = sst [smem:[#allocation7_spill]] %s3862_s12 }
  0x16   :  { %4856 = sst [smem:[#allocation8_spill]] %s3867_s20 }
  0x17   :  { %4857 = sst [smem:[#allocation9_spill]] %s3872_s27 }
  0x18   :  { %4858 = sst [smem:[#allocation10_spill]] %s3877_s4 }
  0x19   :  { %s3882_s12 = sld [smem:[%s4848_s0 + %s3759_s7]]   ;;  %s3763_s7 = smov 22  }
  0x1a   :  { %s3887_s20 = sld [smem:[%s4848_s0 + %s3760_s15]]   ;;  %s3764_s15 = smov 23  }
  0x1b   :  { %s3892_s27 = sld [smem:[%s4848_s0 + %s3761_s22]]   ;;  %s3765_s22 = smov 24  }
  0x1c   :  { %s3897_s4 = sld [smem:[%s4848_s0 + %s3762_s28]]   ;;  %s3766_s28 = smov 25  }
  0x1f   :  { %4859 = sst [smem:[#allocation11_spill]] %s3882_s12 }
  0x20   :  { %4860 = sst [smem:[#allocation12_spill]] %s3887_s20 }
  0x21   :  { %4861 = sst [smem:[#allocation13_spill]] %s3892_s27 }
  0x22   :  { %4862 = sst [smem:[#allocation14_spill]] %s3897_s4 }
  0x23   :  { %s3902_s12 = sld [smem:[%s4848_s0 + %s3763_s7]]   ;;  %s3767_s7 = smov 26  }
  0x24   :  { %s3907_s20 = sld [smem:[%s4848_s0 + %s3764_s15]]   ;;  %s3768_s15 = smov 27  }
  0x25   :  { %s3912_s27 = sld [smem:[%s4848_s0 + %s3765_s22]]   ;;  %s3769_s22 = smov 28  }
  0x26   :  { %s3917_s4 = sld [smem:[%s4848_s0 + %s3766_s28]]   ;;  %s3770_s28 = smov 29  }
  0x29   :  { %4863 = sst [smem:[#allocation15_spill]] %s3902_s12 }
  0x2a   :  { %4864 = sst [smem:[#allocation16_spill]] %s3907_s20 }
  0x2b   :  { %4865 = sst [smem:[#allocation17_spill]] %s3912_s27 }
  0x2c   :  { %4866 = sst [smem:[#allocation18_spill]] %s3917_s4 }
  0x2d   :  { %s3922_s12 = sld [smem:[%s4848_s0 + %s3767_s7]]   ;;  %s3771_s7 = smov 30  }
  0x2e   :  { %s3927_s20 = sld [smem:[%s4848_s0 + %s3768_s15]]   ;;  %s3772_s15 = smov 31  }
  0x2f   :  { %s3932_s27 = sld [smem:[%s4848_s0 + %s3769_s22]]  }
  0x30   :  { %s3937_s4 = sld [smem:[%s4848_s0 + %s3770_s28]]  }
  0x33   :  { %4867 = sst [smem:[#allocation19_spill]] %s3922_s12 }
  0x34   :  { %4868 = sst [smem:[#allocation20_spill]] %s3927_s20 }
  0x35   :  { %4869 = sst [smem:[#allocation21_spill]] %s3932_s27 }
  0x36   :  { %s3942_s12 = sld [smem:[%s4848_s0 + %s3771_s7]]  }
  0x37   :  { %s3045_s20 = sld [smem:[%s4848_s0 + %s3772_s15]]  }
  0x38   :  { %s3950_s27 = sld [smem:[%s4848_s0 + %s3773_s23]]  }
  0x3d   :  { %v70_v0 = vstv %s3045_s20 }
  0x3e   :  { %71 = vst [vmem:[#allocation3] sm:$0x1] %v70_v0 }
  0x3f   :  { %72 = vsyncpa [#allocation5], 0  ;;  %s3774_s28 = smov [#allocation4]  }
  0x40   :  { %s78_s1 = sshll.u32 %s3774_s28, 4  ;;  %s79_s1 = int_to_ptr.vmem [resolvable:$true] %s78_s1 }
  0x41   :  { %s3728_s2 = scalar_lea.vmem %s79_s1, 6144  ;;  %p3733_p1 = scmp.lt.s32.totalorder %s79_s1, %s79_s1 }
  0x42   :  { %p3729_p0 = scmp.ne.s32.totalorder %s79_s1, %s3728_s2  ;;  %p3734_p2 = scmp.lt.s32.totalorder %s3728_s2, %s3728_s2 }
  0x44   :  { %p3735_p3 = por %p3734_p2, %p3733_p1 }
  0x46   :  { %p3736_p4 = pnand %p3735_p3, %p3729_p0 }
  0x48   :  { %3739 = shalt.err (!%p3736_p4)
}
  0x49   :  { %s3775_s7 = smov 256   ;;  %s3776_s10 = smov 16  }
  0x4a   :  { %84 = dma.hbm_to_vmem [thread:$0]  %s3792_s5, 6144, %s79_s1, [#allocation5], %s3775_s7, %s3775_s7, %s3776_s10  }
  0x4b   :  { %3740 = dma.done.wait [#allocation5], 6144  }
  0x4c   :  { %3741 = vsyncadd [#allocation5], 4294961152  ;;  %vm296_vm0 = vcmask 1043456   ;;  %vm223_vm1 = vcmask 31744   ;;  %v222_v1 = vld [vmem:[%s3802_s13] sm:$0xf] }
  0x4d   :  { %v198_v2 = vld [vmem:[%s3797_s9] sm:$0xff]  ;;  %v199_v3 = vld [vmem:[%s3797_s9 + $0x8] sm:$0xff]  ;;  %3384 = vmatprep.subr.msk.mxu0 %vm296_vm0, %v222_v1  ;;  %v200_v4 = vld [vmem:[%s3797_s9 + $0x10] sm:$0xff]  ;;  %v4851_v26 = vmov 0.0   ;;  %vm492_vm2 = vcmask 523264   ;;  %vm775_vm3 = vcmask 64512  }
  0x4e   :  { %3386 = vmatprep.mubr.msk.f32.mxu0 %vm223_vm1, %v198_v2  ;;  %3385 = vmatpush3.msk.msra.mxu0 %vm296_vm0, %v222_v1  ;;  %v201_v5 = vld [vmem:[%s3797_s9 + $0x18] sm:$0xff]  ;;  %v202_v6 = vld [vmem:[%s3797_s9 + $0x20] sm:$0xff]  ;;  %v203_v7 = vld [vmem:[%s3797_s9 + $0x28] sm:$0xff]  ;;  %s3778_s0 = smov 8   ;;  %vm1890_vm4 = vcmask 130048   ;;  %s3779_s5 = smov 1  }
  0x4f   :  { %3387 = vmatmul.mubr.msk.f32.vlgmr.msra.gmra.mxu0 %vm223_vm1, %v199_v3  ;;  %v204_v8 = vld [vmem:[%s3797_s9 + $0x30] sm:$0xff]  ;;  %v205_v9 = vld [vmem:[%s3797_s9 + $0x38] sm:$0xff]  ;;  %v206_v10 = vld [vmem:[%s3797_s9 + $0x40] sm:$0xff]  ;;  %565 = vmatprep.subr.mxu0 %v4851_v26  ;;  %vm1946_vm5 = vcmask 7168   ;;  %vm1921_vm7 = vcmask 15360   ;;  %vm3782_vm9 = vmmov 0  }
  0x50   :  { %3389 = vmatprep.mubr.msk.f32.mxu0 %vm223_vm1, %v200_v4  ;;  %v207_v11 = vld [vmem:[%s3797_s9 + $0x48] sm:$0xff]  ;;  %v208_v12 = vld [vmem:[%s3797_s9 + $0x50] sm:$0xff]  ;;  %v209_v13 = vld [vmem:[%s3797_s9 + $0x58] sm:$0xff]  ;;  %3601 = vmatprep.subr.mxu1 %v4851_v26  ;;  %vm2051_vm10 = vcmask 195584   ;;  %vm2133_vm11 = vcmask 392192   ;;  %s4877_s13 = sld [smem:[#allocation8_spill]] }
  0x51   :  { %v210_v14 = vld [vmem:[%s3797_s9 + $0x60] sm:$0xff]  ;;  %v211_v15 = vld [vmem:[%s3797_s9 + $0x68] sm:$0xff]  ;;  %v212_v16 = vld [vmem:[%s3797_s9 + $0x70] sm:$0xff]  ;;  %s4894_s20 = sld [smem:[#allocation17_spill]]  ;;  %vm2932_vm15 = vcmask 97280  }
  0x52   :  { %v213_v17 = vld [vmem:[%s3797_s9 + $0x78] sm:$0xff]  ;;  %v214_v18 = vld [vmem:[%s3797_s9 + $0x80] sm:$0xff]  ;;  %v215_v19 = vld [vmem:[%s3797_s9 + $0x88] sm:$0xff]  ;;  %s4895_s11 = sld [smem:[#allocation19_spill]] }
  0x53   :  { %3390 = vmatmul.mubr.msk.f32.gmra.mxu0 %vm223_vm1, %v201_v5  ;;  %v216_v20 = vld [vmem:[%s3797_s9 + $0x90] sm:$0xff]  ;;  %v217_v21 = vld [vmem:[%s3797_s9 + $0x98] sm:$0xff]  ;;  %v218_v22 = vld [vmem:[%s3797_s9 + $0xa0] sm:$0xff]  ;;  %s4896_s15 = sld [smem:[#allocation21_spill]] }
  0x54   :  { %3392 = vmatprep.mubr.msk.f32.mxu0 %vm223_vm1, %v202_v6  ;;  %v219_v23 = vld [vmem:[%s3797_s9 + $0xa8] sm:$0xff]  ;;  %v220_v24 = vld [vmem:[%s3797_s9 + $0xb0] sm:$0xff]  ;;  %v221_v25 = vld [vmem:[%s3797_s9 + $0xb8] sm:$0xff]  ;;  %s3780_s9 = smov 2   ;;  %s4897_s16 = sld [smem:[#allocation20_spill]] }
  0x55   :  { %v4007_v27 = vld [vmem:[#allocation4 + $0x8] sm:$0xff]  ;;  %v4081_v53 = vld [vmem:[#allocation4] sm:$0xff]  ;;  %v4087_v55 = vld [vmem:[#allocation4 + $0x18] sm:$0xff] }
  0x56   :  { %v4009_v28 = vld [vmem:[#allocation4 + $0x28] sm:$0xff]  ;;  %v4083_v54 = vld [vmem:[#allocation4 + $0x20] sm:$0xff]  ;;  %v4089_v56 = vld [vmem:[#allocation4 + $0x38] sm:$0xff] }
  0x57   :  { %3393 = vmatmul.mubr.msk.f32.gmra.mxu0 %vm223_vm1, %v203_v7  ;;  %3075 = vmatprep.mubr.msk.f32.mxu1 %vm492_vm2, %v4009_v28  ;;  %v4099_v57 = vld [vmem:[#allocation4 + $0x10] sm:$0xff]  ;;  %v4103_v59 = vld [vmem:[#allocation4 + $0x48] sm:$0xff]  ;;  %v4109_v60 = vld [vmem:[#allocation4 + $0x40] sm:$0xff] }
  0x58   :  { %3395 = vmatprep.mubr.msk.f32.mxu0 %vm223_vm1, %v204_v8  ;;  %v4101_v58 = vld [vmem:[#allocation4 + $0x30] sm:$0xff]  ;;  %v4111_v61 = vld [vmem:[#allocation4 + $0x58] sm:$0xff]  ;;  %v4118_v63 = vld [vmem:[#allocation4 + $0x68] sm:$0xff] }
  0x59   :  { %v4116_v62 = vld [vmem:[#allocation4 + $0x50] sm:$0xff]  ;;  %v4123_v0 = vld [vmem:[#allocation4 + $0x60] sm:$0xff]  ;;  %v4125_v1 = vld [vmem:[#allocation4 + $0x78] sm:$0xff] }
  0x5a   :  { %v4130_v2 = vld [vmem:[#allocation4 + $0x70] sm:$0xff]  ;;  %v4132_v3 = vld [vmem:[#allocation4 + $0x88] sm:$0xff]  ;;  %v4137_v4 = vld [vmem:[#allocation4 + $0x80] sm:$0xff] }
  0x5b   :  { %3396 = vmatmul.mubr.msk.f32.gmra.mxu0 %vm223_vm1, %v205_v9  ;;  %v4139_v5 = vld [vmem:[#allocation4 + $0x98] sm:$0xff]  ;;  %v4144_v6 = vld [vmem:[#allocation4 + $0x90] sm:$0xff]  ;;  %v4146_v7 = vld [vmem:[#allocation4 + $0xa8] sm:$0xff] }
  0x5c   :  { %3398 = vmatprep.mubr.msk.f32.mxu0 %vm223_vm1, %v206_v10  ;;  %v4151_v8 = vld [vmem:[#allocation4 + $0xa0] sm:$0xff]  ;;  %v4153_v9 = vld [vmem:[#allocation4 + $0xb8] sm:$0xff]  ;;  %v4158_v10 = vld [vmem:[#allocation4 + $0xb0] sm:$0xff] }
  0x5d   :  { %vm4643_vm6 = vmneg %vm1946_vm5 }
  0x5e   :  { %vm4662_vm8 = vmneg %vm1921_vm7 }
  0x5f   :  { %3399 = vmatmul.mubr.msk.f32.gmra.mxu0 %vm223_vm1, %v207_v11  ;;  %v4160_v11 = vld [vmem:[#allocation4 + $0xc8] sm:$0xff]  ;;  %vm4728_vm12 = vmneg %vm223_vm1 }
  0x60   :  { %3401 = vmatprep.mubr.msk.f32.mxu0 %vm223_vm1, %v208_v12  ;;  %v4165_v12 = vld [vmem:[#allocation4 + $0xc0] sm:$0xff]  ;;  %vm4761_vm13 = vmneg %vm775_vm3 }
  0x61   :  { %vm4794_vm14 = vmneg %vm1890_vm4 }
  0x63   :  { %3402 = vmatmul.mubr.msk.f32.gmra.mxu0 %vm223_vm1, %v209_v13  ;;  %v4167_v13 = vld [vmem:[#allocation4 + $0xd8] sm:$0xff] }
  0x64   :  { %3404 = vmatprep.mubr.msk.f32.mxu0 %vm223_vm1, %v210_v14  ;;  %v4172_v14 = vld [vmem:[#allocation4 + $0xd0] sm:$0xff] }
  0x67   :  { %3405 = vmatmul.mubr.msk.f32.gmra.mxu0 %vm223_vm1, %v211_v15  ;;  %v4174_v15 = vld [vmem:[#allocation4 + $0xe8] sm:$0xff] }
  0x68   :  { %3407 = vmatprep.mubr.msk.f32.mxu0 %vm223_vm1, %v212_v16  ;;  %v4179_v16 = vld [vmem:[#allocation4 + $0xe0] sm:$0xff] }
  0x6b   :  { %3408 = vmatmul.mubr.msk.f32.gmra.mxu0 %vm223_vm1, %v213_v17  ;;  %v4181_v17 = vld [vmem:[#allocation4 + $0xf8] sm:$0xff] }
  0x6c   :  { %3410 = vmatprep.mubr.msk.f32.mxu0 %vm223_vm1, %v214_v18  ;;  %v4186_v18 = vld [vmem:[#allocation4 + $0xf0] sm:$0xff] }
  0x6f   :  { %3411 = vmatmul.mubr.msk.f32.gmra.mxu0 %vm223_vm1, %v215_v19  ;;  %v4188_v19 = vld [vmem:[#allocation4 + $0x108] sm:$0xff] }
  0x70   :  { %3413 = vmatprep.mubr.msk.f32.mxu0 %vm223_vm1, %v216_v20  ;;  %v4193_v20 = vld [vmem:[#allocation4 + $0x100] sm:$0xff] }
  0x73   :  { %3414 = vmatmul.mubr.msk.f32.gmra.mxu0 %vm223_vm1, %v217_v21  ;;  %v4195_v21 = vld [vmem:[#allocation4 + $0x118] sm:$0xff] }
  0x74   :  { %3416 = vmatprep.mubr.msk.f32.mxu0 %vm223_vm1, %v218_v22  ;;  %v4200_v22 = vld [vmem:[#allocation4 + $0x110] sm:$0xff] }
  0x77   :  { %3417 = vmatmul.mubr.msk.f32.gmra.mxu0 %vm223_vm1, %v219_v23  ;;  %v4202_v23 = vld [vmem:[#allocation4 + $0x128] sm:$0xff] }
  0x78   :  { %3419 = vmatprep.mubr.msk.f32.mxu0 %vm223_vm1, %v220_v24  ;;  %v4207_v24 = vld [vmem:[#allocation4 + $0x120] sm:$0xff] }
  0x7b   :  { %3420 = vmatmul.mubr.msk.f32.gmra.mxu0 %vm223_vm1, %v221_v25  ;;  %v4209_v25 = vld [vmem:[#allocation4 + $0x138] sm:$0xff] }
  0x7c   :  { %3073 = vmatprep.mubr.msk.f32.mxu0 %vm492_vm2, %v4007_v27 }
 0x10f   :  { %v4015_v29 = vpop.f32.mrf.mxu0 }
 0x111   :  { %v4017_v30 = vpop.f32.mrf.mxu0 }
 0x113   :  { %v4019_v31 = vpop.f32.mrf.mxu0 }
 0x115   :  { %v4021_v32 = vpop.f32.mrf.mxu0 }
 0x117   :  { %v3394_v33 = vpop.f32.mrf.mxu0 }
 0x119   :  { %v386_v34 = vpop.f32.mrf.mxu0 }
 0x11b   :  { %v3397_v35 = vpop.f32.mrf.mxu0 }
 0x11d   :  { %v396_v36 = vpop.f32.mrf.mxu0 }
 0x11f   :  { %v3400_v37 = vpop.f32.mrf.mxu0 }
 0x121   :  { %v406_v38 = vpop.f32.mrf.mxu0 }
 0x123   :  { %v3403_v39 = vpop.f32.mrf.mxu0 }
 0x125   :  { %v416_v40 = vpop.f32.mrf.mxu0 }
 0x127   :  { %v3406_v41 = vpop.f32.mrf.mxu0 }
 0x129   :  { %v426_v42 = vpop.f32.mrf.mxu0 }
 0x12b   :  { %v3409_v43 = vpop.f32.mrf.mxu0 }
 0x12c   :  { %566 = vmatpush1.msra.mxu0 %v3409_v43  ;;  %3625 = vmatpush1.msra.mxu1 %v3409_v43 }
 0x12d   :  { %v436_v44 = vpop.f32.mrf.mxu0  ;;  %567 = vmatprep.subr.mxu0 %v4851_v26  ;;  %3602 = vmatprep.subr.mxu1 %v4851_v26 }
 0x12e   :  { %568 = vmatpush1.msra.mxu0 %v436_v44  ;;  %3626 = vmatpush1.msra.mxu1 %v436_v44 }
 0x12f   :  { %569 = vmatprep.subr.mxu0 %v4851_v26  ;;  %3603 = vmatprep.subr.mxu1 %v4851_v26  ;;  %v4029_v45 = vpop.f32.mrf.mxu0 }
 0x130   :  { %570 = vmatpush1.msra.mxu0 %v3406_v41  ;;  %3627 = vmatpush1.msra.mxu1 %v3406_v41 }
 0x131   :  { %571 = vmatprep.subr.mxu0 %v4851_v26  ;;  %3604 = vmatprep.subr.mxu1 %v4851_v26  ;;  %v4035_v46 = vpop.f32.mrf.mxu0 }
 0x132   :  { %572 = vmatpush1.msra.mxu0 %v426_v42  ;;  %3628 = vmatpush1.msra.mxu1 %v426_v42 }
 0x133   :  { %573 = vmatprep.subr.mxu0 %v4851_v26  ;;  %3605 = vmatprep.subr.mxu1 %v4851_v26  ;;  %v3415_v47 = vpop.f32.mrf.mxu0 }
 0x134   :  { %574 = vmatpush1.msra.mxu0 %v3403_v39  ;;  %3629 = vmatpush1.msra.mxu1 %v3403_v39  ;;  %v4248_v39 = vld [vmem:[%s3807_s17] ss:$0 sm:$0xff]  ;;  %s4878_s17 = sld [smem:[#allocation7_spill]] }
 0x135   :  { %575 = vmatprep.subr.mxu0 %v4851_v26  ;;  %3606 = vmatprep.subr.mxu1 %v4851_v26  ;;  %v456_v48 = vpop.f32.mrf.mxu0 }
 0x136   :  { %576 = vmatpush1.msra.mxu0 %v416_v40  ;;  %3630 = vmatpush1.msra.mxu1 %v416_v40 }
 0x137   :  { %577 = vmatprep.subr.mxu0 %v4851_v26  ;;  %3607 = vmatprep.subr.mxu1 %v4851_v26  ;;  %v3418_v49 = vpop.f32.mrf.mxu0 }
 0x138   :  { %578 = vmatpush1.msra.mxu0 %v3400_v37  ;;  %3631 = vmatpush1.msra.mxu1 %v3400_v37  ;;  %v4239_v37 = vld [vmem:[#allocation4 + $0x178] sm:$0xff] }
 0x139   :  { %579 = vmatprep.subr.mxu0 %v4851_v26  ;;  %3608 = vmatprep.subr.mxu1 %v4851_v26  ;;  %v466_v50 = vpop.f32.mrf.mxu0 }
 0x13a   :  { %580 = vmatpush1.msra.mxu0 %v406_v38  ;;  %3632 = vmatpush1.msra.mxu1 %v406_v38  ;;  %v4244_v38 = vld [vmem:[#allocation4 + $0x170] sm:$0xff] }
 0x13b   :  { %581 = vmatprep.subr.mxu0 %v4851_v26  ;;  %3609 = vmatprep.subr.mxu1 %v4851_v26  ;;  %v3421_v51 = vpop.f32.mrf.mxu0  ;;  %4870 = vst [vmem:[#allocation22_spill] sm:$0xff] %v4244_v38 }
 0x13c   :  { %582 = vmatpush1.msra.mxu0 %v3397_v35  ;;  %3633 = vmatpush1.msra.mxu1 %v3397_v35  ;;  %v4232_v35 = vld [vmem:[#allocation4 + $0x168] sm:$0xff] }
 0x13d   :  { %583 = vmatprep.subr.mxu0 %v4851_v26  ;;  %3610 = vmatprep.subr.mxu1 %v4851_v26  ;;  %v476_v52 = vpop.f32.mrf.mxu0 }
 0x13e   :  { %584 = vmatpush1.msra.mxu0 %v396_v36  ;;  %3634 = vmatpush1.msra.mxu1 %v396_v36  ;;  %v4237_v36 = vld [vmem:[#allocation4 + $0x160] sm:$0xff] }
 0x13f   :  { %585 = vmatprep.subr.mxu0 %v4851_v26  ;;  %3611 = vmatprep.subr.mxu1 %v4851_v26 }
 0x140   :  { %586 = vmatpush1.msra.mxu0 %v3394_v33  ;;  %3635 = vmatpush1.msra.mxu1 %v3394_v33  ;;  %v774_v33 = vld [vmem:[%s3812_s21] sm:$0xff]  ;;  %s3783_s21 = smov 4  }
 0x141   :  { %587 = vmatprep.subr.mxu0 %v4851_v26  ;;  %3612 = vmatprep.subr.mxu1 %v4851_v26 }
 0x142   :  { %588 = vmatpush1.msra.mxu0 %v386_v34  ;;  %3636 = vmatpush1.msra.mxu1 %v386_v34  ;;  %v4229_v34 = vld [vmem:[#allocation4 + $0x150] sm:$0xff] }
 0x143   :  { %589 = vmatprep.subr.mxu0 %v4851_v26  ;;  %3613 = vmatprep.subr.mxu1 %v4851_v26 }
 0x144   :  { %590 = vmatpush1.msra.mxu0 %v4019_v31  ;;  %3637 = vmatpush1.msra.mxu1 %v4019_v31  ;;  %v4221_v31 = vld [vmem:[#allocation4 + $0x140] sm:$0xff] }
 0x145   :  { %591 = vmatprep.subr.mxu0 %v4851_v26  ;;  %3614 = vmatprep.subr.mxu1 %v4851_v26 }
 0x146   :  { %592 = vmatpush1.msra.mxu0 %v4021_v32  ;;  %3638 = vmatpush1.msra.mxu1 %v4021_v32  ;;  %v4223_v32 = vld [vmem:[#allocation4 + $0x158] sm:$0xff] }
 0x147   :  { %593 = vmatprep.subr.mxu0 %v4851_v26  ;;  %3615 = vmatprep.subr.mxu1 %v4851_v26 }
 0x148   :  { %594 = vmatpush1.msra.mxu0 %v4015_v29  ;;  %3639 = vmatpush1.msra.mxu1 %v4015_v29  ;;  %v4214_v29 = vld [vmem:[#allocation4 + $0x130] sm:$0xff] }
 0x149   :  { %595 = vmatprep.subr.mxu0 %v4851_v26  ;;  %3616 = vmatprep.subr.mxu1 %v4851_v26 }
 0x14a   :  { %596 = vmatpush1.msra.mxu0 %v4017_v30  ;;  %3640 = vmatpush1.msra.mxu1 %v4017_v30  ;;  %v4216_v30 = vld [vmem:[#allocation4 + $0x148] sm:$0xff] }
 0x14b   :  { %613 = vmatprep.subr.mxu0 %v4851_v26  ;;  %3617 = vmatprep.subr.mxu1 %v4851_v26 }
 0x14c   :  { %614 = vmatpush2.msra.mxu0 %v3421_v51  ;;  %3641 = vmatpush2.msra.mxu1 %v3421_v51 }
 0x14d   :  { %615 = vmatprep.subr.mxu0 %v4851_v26  ;;  %3618 = vmatprep.subr.mxu1 %v4851_v26 }
 0x14e   :  { %616 = vmatpush2.msra.mxu0 %v476_v52  ;;  %3642 = vmatpush2.msra.mxu1 %v476_v52 }
 0x14f   :  { %617 = vmatprep.subr.mxu0 %v4851_v26  ;;  %3619 = vmatprep.subr.mxu1 %v4851_v26 }
 0x150   :  { %618 = vmatpush2.msra.mxu0 %v3418_v49  ;;  %3643 = vmatpush2.msra.mxu1 %v3418_v49 }
 0x151   :  { %619 = vmatprep.subr.mxu0 %v4851_v26  ;;  %3620 = vmatprep.subr.mxu1 %v4851_v26 }
 0x152   :  { %620 = vmatpush2.msra.mxu0 %v466_v50  ;;  %3644 = vmatpush2.msra.mxu1 %v466_v50 }
 0x153   :  { %621 = vmatprep.subr.mxu0 %v4851_v26  ;;  %3621 = vmatprep.subr.mxu1 %v4851_v26 }
 0x154   :  { %622 = vmatpush2.msra.mxu0 %v3415_v47  ;;  %3645 = vmatpush2.msra.mxu1 %v3415_v47 }
 0x155   :  { %623 = vmatprep.subr.mxu0 %v4851_v26  ;;  %3622 = vmatprep.subr.mxu1 %v4851_v26 }
 0x156   :  { %624 = vmatpush2.msra.mxu0 %v456_v48  ;;  %3646 = vmatpush2.msra.mxu1 %v456_v48 }
 0x157   :  { %625 = vmatprep.subr.mxu0 %v4851_v26  ;;  %3623 = vmatprep.subr.mxu1 %v4851_v26 }
 0x158   :  { %626 = vmatpush2.msra.mxu0 %v4029_v45  ;;  %3647 = vmatpush2.msra.mxu1 %v4029_v45 }
 0x159   :  { %627 = vmatprep.subr.mxu0 %v4851_v26  ;;  %3624 = vmatprep.subr.mxu1 %v4851_v26 }
 0x15a   :  { %628 = vmatpush2.msra.mxu0 %v4035_v46  ;;  %3648 = vmatpush2.msra.mxu1 %v4035_v46 }
 0x15b   :  { %630 = vmatmul.mubr.f32.vlgmr.msra.gmra.mxu0 %v4081_v53  ;;  %640 = vmatmul.mubr.f32.vlgmr.msra.gmra.mxu1 %v4083_v54 }
 0x15c   :  { %3074 = vmatprep.mubr.msk.f32.mxu0 %vm492_vm2, %v4087_v55  ;;  %3076 = vmatprep.mubr.msk.f32.mxu1 %vm492_vm2, %v4089_v56 }
 0x15d   :  { %3422 = vmatprep.subr.mxu0 %v774_v33 }
 0x15e   :  { %3423 = vmatpush3.msra.mxu0 %v774_v33 }
 0x15f   :  { %635 = vmatmul.mubr.f32.gmra.mxu0 %v4099_v57  ;;  %645 = vmatmul.mubr.f32.gmra.mxu1 %v4101_v58 }
 0x160   :  { %3077 = vmatprep.mubr.msk.f32.mxu1 %vm492_vm2, %v4103_v59  ;;  %1040 = vmatprep.subr.mxu0 %v4851_v26 }
 0x163   :  { %650 = vmatmul.mubr.f32.gmra.mxu1 %v4109_v60 }
 0x164   :  { %3078 = vmatprep.mubr.msk.f32.mxu1 %vm492_vm2, %v4111_v61 }
 0x167   :  { %655 = vmatmul.mubr.f32.gmra.mxu1 %v4116_v62 }
 0x168   :  { %3079 = vmatprep.mubr.msk.f32.mxu1 %vm492_vm2, %v4118_v63 }
 0x16b   :  { %660 = vmatmul.mubr.f32.gmra.mxu1 %v4123_v0 }
 0x16c   :  { %3080 = vmatprep.mubr.msk.f32.mxu1 %vm492_vm2, %v4125_v1 }
 0x16f   :  { %665 = vmatmul.mubr.f32.gmra.mxu1 %v4130_v2 }
 0x170   :  { %3081 = vmatprep.mubr.msk.f32.mxu1 %vm492_vm2, %v4132_v3 }
 0x173   :  { %670 = vmatmul.mubr.f32.gmra.mxu1 %v4137_v4 }
 0x174   :  { %3082 = vmatprep.mubr.msk.f32.mxu1 %vm492_vm2, %v4139_v5 }
 0x177   :  { %675 = vmatmul.mubr.f32.gmra.mxu1 %v4144_v6 }
 0x178   :  { %3083 = vmatprep.mubr.msk.f32.mxu1 %vm492_vm2, %v4146_v7 }
 0x17b   :  { %680 = vmatmul.mubr.f32.gmra.mxu1 %v4151_v8 }
 0x17c   :  { %3084 = vmatprep.mubr.msk.f32.mxu1 %vm492_vm2, %v4153_v9 }
 0x17f   :  { %685 = vmatmul.mubr.f32.gmra.mxu1 %v4158_v10 }
 0x180   :  { %3085 = vmatprep.mubr.msk.f32.mxu1 %vm492_vm2, %v4160_v11 }
 0x183   :  { %690 = vmatmul.mubr.f32.gmra.mxu1 %v4165_v12 }
 0x184   :  { %3086 = vmatprep.mubr.msk.f32.mxu1 %vm492_vm2, %v4167_v13 }
 0x187   :  { %695 = vmatmul.mubr.f32.gmra.mxu1 %v4172_v14 }
 0x188   :  { %3087 = vmatprep.mubr.msk.f32.mxu1 %vm492_vm2, %v4174_v15 }
 0x18b   :  { %700 = vmatmul.mubr.f32.gmra.mxu1 %v4179_v16 }
 0x18c   :  { %3088 = vmatprep.mubr.msk.f32.mxu1 %vm492_vm2, %v4181_v17 }
 0x18f   :  { %705 = vmatmul.mubr.f32.gmra.mxu1 %v4186_v18 }
 0x190   :  { %3089 = vmatprep.mubr.msk.f32.mxu1 %vm492_vm2, %v4188_v19 }
 0x193   :  { %710 = vmatmul.mubr.f32.gmra.mxu1 %v4193_v20 }
 0x194   :  { %3090 = vmatprep.mubr.msk.f32.mxu1 %vm492_vm2, %v4195_v21 }
 0x197   :  { %715 = vmatmul.mubr.f32.gmra.mxu1 %v4200_v22 }
 0x198   :  { %3091 = vmatprep.mubr.msk.f32.mxu1 %vm492_vm2, %v4202_v23 }
 0x19b   :  { %720 = vmatmul.mubr.f32.gmra.mxu1 %v4207_v24 }
 0x19c   :  { %3092 = vmatprep.mubr.msk.f32.mxu1 %vm492_vm2, %v4209_v25 }
 0x19f   :  { %725 = vmatmul.mubr.f32.gmra.mxu1 %v4214_v29 }
 0x1a0   :  { %3093 = vmatprep.mubr.msk.f32.mxu1 %vm492_vm2, %v4216_v30 }
 0x1a3   :  { %730 = vmatmul.mubr.f32.gmra.mxu1 %v4221_v31 }
 0x1a4   :  { %3094 = vmatprep.mubr.msk.f32.mxu1 %vm492_vm2, %v4223_v32 }
 0x1a7   :  { %735 = vmatmul.mubr.f32.gmra.mxu1 %v4229_v34 }
 0x1a8   :  { %3095 = vmatprep.mubr.msk.f32.mxu1 %vm492_vm2, %v4232_v35 }
 0x1ab   :  { %740 = vmatmul.mubr.f32.gmra.mxu1 %v4237_v36 }
 0x1ac   :  { %3096 = vmatprep.mubr.msk.f32.mxu1 %vm492_vm2, %v4239_v37 }
 0x1af   :  { %745 = vmatmul.mubr.f32.gmra.mxu1 %v4244_v38 }
 0x21b   :  { %v631_v40 = vpop.f32.mrf.mxu0  ;;  %v641_v41 = vpop.f32.mrf.mxu1 }
 0x21c   :  { %v632_v42 = vadd.f32 %v4248_v39, %v631_v40  ;;  %v642_v46 = vadd.f32 %v4248_v39, %v641_v41 }
 0x21d   :  { %v633_v43 = vpop.f32.mrf.mxu0  ;;  %v643_v44 = vpop.f32.mrf.mxu1 }
 0x21e   :  { %v750_v45 = vmax.f32 %v632_v42, 0.0  ;;  %v752_v26 = vmax.f32 %v642_v46, 0.0 }
 0x21f   :  { %v636_v47 = vpop.f32.mrf.mxu0  ;;  %v646_v48 = vpop.f32.mrf.mxu1 }
 0x220   :  { %v637_v49 = vadd.f32 %v4248_v39, %v636_v47  ;;  %3424 = vmatprep.mubr.msk.f32.mxu0 %vm775_vm3, %v750_v45  ;;  %v647_v33 = vadd.f32 %v4248_v39, %v646_v48 }
 0x221   :  { %v648_v50 = vpop.f32.mrf.mxu1  ;;  %v638_v51 = vpop.f32.mrf.mxu0 }
 0x222   :  { %v751_v52 = vmax.f32 %v637_v49, 0.0  ;;  %v753_v41 = vmax.f32 %v647_v33, 0.0 }
 0x223   :  { %v651_v38 = vpop.f32.mrf.mxu1 }
 0x224   :  { %v652_v40 = vadd.f32 %v4248_v39, %v651_v38  ;;  %3425 = vmatmul.mubr.msk.f32.vlgmr.msra.gmra.mxu0 %vm775_vm3, %v751_v52 }
 0x225   :  { %v653_v42 = vpop.f32.mrf.mxu1  ;;  %3427 = vmatprep.mubr.msk.f32.mxu0 %vm775_vm3, %v752_v26 }
 0x226   :  { %v754_v43 = vmax.f32 %v652_v40, 0.0 }
 0x227   :  { %v656_v44 = vpop.f32.mrf.mxu1 }
 0x228   :  { %v657_v47 = vadd.f32 %v4248_v39, %v656_v44  ;;  %3428 = vmatmul.mubr.msk.f32.gmra.mxu0 %vm775_vm3, %v753_v41 }
 0x229   :  { %v658_v45 = vpop.f32.mrf.mxu1  ;;  %3430 = vmatprep.mubr.msk.f32.mxu0 %vm775_vm3, %v754_v43 }
 0x22a   :  { %v755_v48 = vmax.f32 %v657_v47, 0.0 }
 0x22b   :  { %v661_v46 = vpop.f32.mrf.mxu1 }
 0x22c   :  { %v662_v49 = vadd.f32 %v4248_v39, %v661_v46  ;;  %3431 = vmatmul.mubr.msk.f32.gmra.mxu0 %vm775_vm3, %v755_v48 }
 0x22d   :  { %v663_v38 = vpop.f32.mrf.mxu1 }
 0x22e   :  { %v756_v50 = vmax.f32 %v662_v49, 0.0 }
 0x22f   :  { %v666_v51 = vpop.f32.mrf.mxu1 }
 0x230   :  { %v667_v26 = vadd.f32 %v4248_v39, %v666_v51  ;;  %3433 = vmatprep.mubr.msk.f32.mxu0 %vm775_vm3, %v756_v50 }
 0x231   :  { %v668_v52 = vpop.f32.mrf.mxu1 }
 0x232   :  { %v757_v33 = vmax.f32 %v667_v26, 0.0 }
 0x233   :  { %v671_v40 = vpop.f32.mrf.mxu1 }
 0x234   :  { %v672_v42 = vadd.f32 %v4248_v39, %v671_v40  ;;  %3434 = vmatmul.mubr.msk.f32.gmra.mxu0 %vm775_vm3, %v757_v33 }
 0x235   :  { %v673_v41 = vpop.f32.mrf.mxu1 }
 0x236   :  { %v758_v43 = vmax.f32 %v672_v42, 0.0 }
 0x237   :  { %v676_v44 = vpop.f32.mrf.mxu1 }
 0x238   :  { %v677_v47 = vadd.f32 %v4248_v39, %v676_v44  ;;  %3436 = vmatprep.mubr.msk.f32.mxu0 %vm775_vm3, %v758_v43 }
 0x239   :  { %v678_v45 = vpop.f32.mrf.mxu1 }
 0x23a   :  { %v759_v48 = vmax.f32 %v677_v47, 0.0 }
 0x23b   :  { %v681_v46 = vpop.f32.mrf.mxu1 }
 0x23c   :  { %v682_v49 = vadd.f32 %v4248_v39, %v681_v46  ;;  %3437 = vmatmul.mubr.msk.f32.gmra.mxu0 %vm775_vm3, %v759_v48 }
 0x23d   :  { %v683_v38 = vpop.f32.mrf.mxu1 }
 0x23e   :  { %v760_v50 = vmax.f32 %v682_v49, 0.0 }
 0x23f   :  { %v686_v51 = vpop.f32.mrf.mxu1 }
 0x240   :  { %v687_v26 = vadd.f32 %v4248_v39, %v686_v51  ;;  %3439 = vmatprep.mubr.msk.f32.mxu0 %vm775_vm3, %v760_v50 }
 0x241   :  { %v688_v52 = vpop.f32.mrf.mxu1 }
 0x242   :  { %v761_v33 = vmax.f32 %v687_v26, 0.0 }
 0x243   :  { %v691_v40 = vpop.f32.mrf.mxu1 }
 0x244   :  { %v692_v42 = vadd.f32 %v4248_v39, %v691_v40  ;;  %3440 = vmatmul.mubr.msk.f32.gmra.mxu0 %vm775_vm3, %v761_v33 }
 0x245   :  { %v693_v41 = vpop.f32.mrf.mxu1 }
 0x246   :  { %v762_v43 = vmax.f32 %v692_v42, 0.0 }
 0x247   :  { %v696_v44 = vpop.f32.mrf.mxu1 }
 0x248   :  { %v697_v47 = vadd.f32 %v4248_v39, %v696_v44  ;;  %3442 = vmatprep.mubr.msk.f32.mxu0 %vm775_vm3, %v762_v43 }
 0x249   :  { %v698_v45 = vpop.f32.mrf.mxu1 }
 0x24a   :  { %v763_v48 = vmax.f32 %v697_v47, 0.0 }
 0x24b   :  { %v701_v46 = vpop.f32.mrf.mxu1 }
 0x24c   :  { %v702_v49 = vadd.f32 %v4248_v39, %v701_v46  ;;  %3443 = vmatmul.mubr.msk.f32.gmra.mxu0 %vm775_vm3, %v763_v48 }
 0x24d   :  { %v703_v38 = vpop.f32.mrf.mxu1 }
 0x24e   :  { %v764_v50 = vmax.f32 %v702_v49, 0.0 }
 0x24f   :  { %v706_v51 = vpop.f32.mrf.mxu1 }
 0x250   :  { %v707_v26 = vadd.f32 %v4248_v39, %v706_v51  ;;  %3445 = vmatprep.mubr.msk.f32.mxu0 %vm775_vm3, %v764_v50 }
 0x251   :  { %v708_v52 = vpop.f32.mrf.mxu1 }
 0x252   :  { %v765_v33 = vmax.f32 %v707_v26, 0.0 }
 0x253   :  { %v711_v40 = vpop.f32.mrf.mxu1 }
 0x254   :  { %v712_v42 = vadd.f32 %v4248_v39, %v711_v40  ;;  %3446 = vmatmul.mubr.msk.f32.gmra.mxu0 %vm775_vm3, %v765_v33 }
 0x255   :  { %v713_v41 = vpop.f32.mrf.mxu1 }
 0x256   :  { %v766_v43 = vmax.f32 %v712_v42, 0.0 }
 0x257   :  { %v716_v44 = vpop.f32.mrf.mxu1 }
 0x258   :  { %v717_v47 = vadd.f32 %v4248_v39, %v716_v44  ;;  %3448 = vmatprep.mubr.msk.f32.mxu0 %vm775_vm3, %v766_v43 }
 0x259   :  { %v718_v45 = vpop.f32.mrf.mxu1 }
 0x25a   :  { %v767_v48 = vmax.f32 %v717_v47, 0.0 }
 0x25b   :  { %v721_v46 = vpop.f32.mrf.mxu1 }
 0x25c   :  { %v722_v49 = vadd.f32 %v4248_v39, %v721_v46  ;;  %3449 = vmatmul.mubr.msk.f32.gmra.mxu0 %vm775_vm3, %v767_v48 }
 0x25d   :  { %v723_v38 = vpop.f32.mrf.mxu1 }
 0x25e   :  { %v768_v50 = vmax.f32 %v722_v49, 0.0 }
 0x25f   :  { %v726_v51 = vpop.f32.mrf.mxu1 }
 0x260   :  { %v727_v26 = vadd.f32 %v4248_v39, %v726_v51  ;;  %3451 = vmatprep.mubr.msk.f32.mxu0 %vm775_vm3, %v768_v50 }
 0x261   :  { %v728_v52 = vpop.f32.mrf.mxu1 }
 0x262   :  { %v769_v33 = vmax.f32 %v727_v26, 0.0 }
 0x263   :  { %v731_v40 = vpop.f32.mrf.mxu1 }
 0x264   :  { %v732_v42 = vadd.f32 %v4248_v39, %v731_v40  ;;  %3452 = vmatmul.mubr.msk.f32.gmra.mxu0 %vm775_vm3, %v769_v33 }
 0x265   :  { %v733_v41 = vpop.f32.mrf.mxu1 }
 0x266   :  { %v770_v43 = vmax.f32 %v732_v42, 0.0 }
 0x267   :  { %v736_v44 = vpop.f32.mrf.mxu1 }
 0x268   :  { %v737_v47 = vadd.f32 %v4248_v39, %v736_v44  ;;  %3454 = vmatprep.mubr.msk.f32.mxu0 %vm775_vm3, %v770_v43 }
 0x269   :  { %v738_v45 = vpop.f32.mrf.mxu1 }
 0x26a   :  { %v771_v48 = vmax.f32 %v737_v47, 0.0 }
 0x26b   :  { %v741_v46 = vpop.f32.mrf.mxu1 }
 0x26c   :  { %v742_v49 = vadd.f32 %v4248_v39, %v741_v46  ;;  %3455 = vmatmul.mubr.msk.f32.gmra.mxu0 %vm775_vm3, %v771_v48 }
 0x26d   :  { %v743_v38 = vpop.f32.mrf.mxu1 }
 0x26e   :  { %v772_v50 = vmax.f32 %v742_v49, 0.0 }
 0x26f   :  { %v746_v51 = vpop.f32.mrf.mxu1 }
 0x270   :  { %v747_v26 = vadd.f32 %v4248_v39, %v746_v51  ;;  %3457 = vmatprep.mubr.msk.f32.mxu0 %vm775_vm3, %v772_v50 }
 0x271   :  { %v748_v52 = vpop.f32.mrf.mxu1 }
 0x272   :  { %v773_v33 = vmax.f32 %v747_v26, 0.0 }
 0x274   :  { %3458 = vmatmul.mubr.msk.f32.gmra.mxu0 %vm775_vm3, %v773_v33  ;;  %v4871_v33 = vmov 0.0  }
 0x275   :  { %3122 = vmatprep.mubr.msk.f32.mxu0 %vm492_vm2, %v4007_v27  ;;  %v1249_v27 = vld [vmem:[%s3822_s29] sm:$0xff]  ;;  %s4882_s29 = sld [smem:[#allocation9_spill]] }
 0x276   :  { %3460 = vmatprep.subr.mxu1 %v1249_v27 }
 0x277   :  { %3461 = vmatpush3.msra.mxu1 %v1249_v27 }
 0x278   :  { %1514 = vmatprep.subr.mxu1 %v4871_v33 }
 0x2e4   :  { %v3426_v40 = vpop.f32.mrf.mxu0 }
 0x2e6   :  { %v914_v42 = vpop.f32.mrf.mxu0 }
 0x2e8   :  { %v3429_v41 = vpop.f32.mrf.mxu0 }
 0x2ea   :  { %v924_v43 = vpop.f32.mrf.mxu0 }
 0x2ec   :  { %v3432_v44 = vpop.f32.mrf.mxu0 }
 0x2ee   :  { %v934_v47 = vpop.f32.mrf.mxu0 }
 0x2f4   :  { %v3435_v45 = vpop.f32.mrf.mxu0 }
 0x2f6   :  { %v944_v48 = vpop.f32.mrf.mxu0 }
 0x2fc   :  { %v3438_v46 = vpop.f32.mrf.mxu0 }
 0x2fe   :  { %v954_v49 = vpop.f32.mrf.mxu0 }
 0x304   :  { %v3441_v39 = vpop.f32.mrf.mxu0 }
 0x306   :  { %v964_v38 = vpop.f32.mrf.mxu0 }
 0x30c   :  { %v3444_v50 = vpop.f32.mrf.mxu0 }
 0x30e   :  { %v974_v51 = vpop.f32.mrf.mxu0 }
 0x314   :  { %v3447_v26 = vpop.f32.mrf.mxu0 }
 0x315   :  { %1041 = vmatpush1.msra.mxu0 %v3447_v26 }
 0x316   :  { %v984_v52 = vpop.f32.mrf.mxu0  ;;  %1042 = vmatprep.subr.mxu0 %v4871_v33 }
 0x317   :  { %1043 = vmatpush1.msra.mxu0 %v984_v52 }
 0x318   :  { %1044 = vmatprep.subr.mxu0 %v4871_v33 }
 0x319   :  { %1045 = vmatpush1.msra.mxu0 %v3444_v50 }
 0x31a   :  { %1046 = vmatprep.subr.mxu0 %v4871_v33 }
 0x31b   :  { %1047 = vmatpush1.msra.mxu0 %v974_v51 }
 0x31c   :  { %1048 = vmatprep.subr.mxu0 %v4871_v33  ;;  %v3450_v26 = vpop.f32.mrf.mxu0 }
 0x31d   :  { %1049 = vmatpush1.msra.mxu0 %v3441_v39 }
 0x31e   :  { %1050 = vmatprep.subr.mxu0 %v4871_v33  ;;  %v994_v50 = vpop.f32.mrf.mxu0 }
 0x31f   :  { %1051 = vmatpush1.msra.mxu0 %v964_v38 }
 0x320   :  { %1052 = vmatprep.subr.mxu0 %v4871_v33 }
 0x321   :  { %1053 = vmatpush1.msra.mxu0 %v3438_v46 }
 0x322   :  { %1054 = vmatprep.subr.mxu0 %v4871_v33 }
 0x323   :  { %1055 = vmatpush1.msra.mxu0 %v954_v49 }
 0x324   :  { %1056 = vmatprep.subr.mxu0 %v4871_v33  ;;  %v3453_v39 = vpop.f32.mrf.mxu0 }
 0x325   :  { %1057 = vmatpush1.msra.mxu0 %v3435_v45 }
 0x326   :  { %1058 = vmatprep.subr.mxu0 %v4871_v33  ;;  %v1004_v46 = vpop.f32.mrf.mxu0 }
 0x327   :  { %1059 = vmatpush1.msra.mxu0 %v944_v48 }
 0x328   :  { %1060 = vmatprep.subr.mxu0 %v4871_v33 }
 0x329   :  { %1061 = vmatpush1.msra.mxu0 %v3432_v44 }
 0x32a   :  { %1062 = vmatprep.subr.mxu0 %v4871_v33 }
 0x32b   :  { %1063 = vmatpush1.msra.mxu0 %v934_v47 }
 0x32c   :  { %1064 = vmatprep.subr.mxu0 %v4871_v33  ;;  %v3456_v49 = vpop.f32.mrf.mxu0 }
 0x32d   :  { %1065 = vmatpush1.msra.mxu0 %v3429_v41 }
 0x32e   :  { %1066 = vmatprep.subr.mxu0 %v4871_v33  ;;  %v1014_v45 = vpop.f32.mrf.mxu0 }
 0x32f   :  { %1067 = vmatpush1.msra.mxu0 %v924_v43 }
 0x330   :  { %1068 = vmatprep.subr.mxu0 %v4871_v33 }
 0x331   :  { %1069 = vmatpush1.msra.mxu0 %v3426_v40 }
 0x332   :  { %1070 = vmatprep.subr.mxu0 %v4871_v33 }
 0x333   :  { %1071 = vmatpush1.msra.mxu0 %v914_v42 }
 0x334   :  { %v3459_v48 = vpop.f32.mrf.mxu0  ;;  %1088 = vmatprep.subr.mxu0 %v4871_v33 }
 0x335   :  { %1089 = vmatpush2.msra.mxu0 %v3459_v48 }
 0x336   :  { %v1024_v44 = vpop.f32.mrf.mxu0  ;;  %1090 = vmatprep.subr.mxu0 %v4871_v33 }
 0x337   :  { %1091 = vmatpush2.msra.mxu0 %v1024_v44 }
 0x338   :  { %1092 = vmatprep.subr.mxu0 %v4871_v33 }
 0x339   :  { %1093 = vmatpush2.msra.mxu0 %v3456_v49 }
 0x33a   :  { %1094 = vmatprep.subr.mxu0 %v4871_v33 }
 0x33b   :  { %1095 = vmatpush2.msra.mxu0 %v1014_v45 }
 0x33c   :  { %1096 = vmatprep.subr.mxu0 %v4871_v33 }
 0x33d   :  { %1097 = vmatpush2.msra.mxu0 %v3453_v39 }
 0x33e   :  { %1098 = vmatprep.subr.mxu0 %v4871_v33 }
 0x33f   :  { %1099 = vmatpush2.msra.mxu0 %v1004_v46 }
 0x340   :  { %1100 = vmatprep.subr.mxu0 %v4871_v33 }
 0x341   :  { %1101 = vmatpush2.msra.mxu0 %v3450_v26 }
 0x342   :  { %1102 = vmatprep.subr.mxu0 %v4871_v33 }
 0x343   :  { %1103 = vmatpush2.msra.mxu0 %v994_v50 }
 0x344   :  { %1105 = vmatmul.mubr.f32.vlgmr.msra.gmra.mxu0 %v4081_v53  ;;  %1964 = vmatprep.subr.mxu0 %v4871_v33  ;;  %v4397_v53 = vld [vmem:[%s3817_s25] ss:$0 sm:$0xff]  ;;  %s4881_s25 = sld [smem:[#allocation10_spill]] }
 0x345   :  { %3123 = vmatprep.mubr.msk.f32.mxu0 %vm492_vm2, %v4087_v55 }
 0x348   :  { %1110 = vmatmul.mubr.f32.gmra.mxu0 %v4099_v57 }
 0x349   :  { %3124 = vmatprep.mubr.msk.f32.mxu0 %vm492_vm2, %v4009_v28  ;;  %v4872_v28 = vld [vmem:[#allocation22_spill] sm:$0xff] }
 0x34c   :  { %1115 = vmatmul.mubr.f32.gmra.mxu0 %v4083_v54 }
 0x34d   :  { %3125 = vmatprep.mubr.msk.f32.mxu0 %vm492_vm2, %v4089_v56 }
 0x350   :  { %1120 = vmatmul.mubr.f32.gmra.mxu0 %v4101_v58 }
 0x351   :  { %3126 = vmatprep.mubr.msk.f32.mxu0 %vm492_vm2, %v4103_v59 }
 0x354   :  { %1125 = vmatmul.mubr.f32.gmra.mxu0 %v4109_v60 }
 0x355   :  { %3127 = vmatprep.mubr.msk.f32.mxu0 %vm492_vm2, %v4111_v61 }
 0x358   :  { %1130 = vmatmul.mubr.f32.gmra.mxu0 %v4116_v62 }
 0x359   :  { %3128 = vmatprep.mubr.msk.f32.mxu0 %vm492_vm2, %v4118_v63 }
 0x35c   :  { %1135 = vmatmul.mubr.f32.gmra.mxu0 %v4123_v0 }
 0x35d   :  { %3129 = vmatprep.mubr.msk.f32.mxu0 %vm492_vm2, %v4125_v1 }
 0x360   :  { %1140 = vmatmul.mubr.f32.gmra.mxu0 %v4130_v2 }
 0x361   :  { %3130 = vmatprep.mubr.msk.f32.mxu0 %vm492_vm2, %v4132_v3 }
 0x364   :  { %1145 = vmatmul.mubr.f32.gmra.mxu0 %v4137_v4 }
 0x365   :  { %3131 = vmatprep.mubr.msk.f32.mxu0 %vm492_vm2, %v4139_v5 }
 0x368   :  { %1150 = vmatmul.mubr.f32.gmra.mxu0 %v4144_v6 }
 0x369   :  { %3132 = vmatprep.mubr.msk.f32.mxu0 %vm492_vm2, %v4146_v7 }
 0x36c   :  { %1155 = vmatmul.mubr.f32.gmra.mxu0 %v4151_v8 }
 0x36d   :  { %3133 = vmatprep.mubr.msk.f32.mxu0 %vm492_vm2, %v4153_v9 }
 0x370   :  { %1160 = vmatmul.mubr.f32.gmra.mxu0 %v4158_v10 }
 0x371   :  { %3134 = vmatprep.mubr.msk.f32.mxu0 %vm492_vm2, %v4160_v11 }
 0x374   :  { %1165 = vmatmul.mubr.f32.gmra.mxu0 %v4165_v12 }
 0x375   :  { %3135 = vmatprep.mubr.msk.f32.mxu0 %vm492_vm2, %v4167_v13 }
 0x378   :  { %1170 = vmatmul.mubr.f32.gmra.mxu0 %v4172_v14 }
 0x379   :  { %3136 = vmatprep.mubr.msk.f32.mxu0 %vm492_vm2, %v4174_v15 }
 0x37c   :  { %1175 = vmatmul.mubr.f32.gmra.mxu0 %v4179_v16 }
 0x37d   :  { %3137 = vmatprep.mubr.msk.f32.mxu0 %vm492_vm2, %v4181_v17 }
 0x380   :  { %1180 = vmatmul.mubr.f32.gmra.mxu0 %v4186_v18 }
 0x381   :  { %3138 = vmatprep.mubr.msk.f32.mxu0 %vm492_vm2, %v4188_v19 }
 0x384   :  { %1185 = vmatmul.mubr.f32.gmra.mxu0 %v4193_v20 }
 0x385   :  { %3139 = vmatprep.mubr.msk.f32.mxu0 %vm492_vm2, %v4195_v21 }
 0x388   :  { %1190 = vmatmul.mubr.f32.gmra.mxu0 %v4200_v22 }
 0x389   :  { %3140 = vmatprep.mubr.msk.f32.mxu0 %vm492_vm2, %v4202_v23 }
 0x38c   :  { %1195 = vmatmul.mubr.f32.gmra.mxu0 %v4207_v24 }
 0x38d   :  { %3141 = vmatprep.mubr.msk.f32.mxu0 %vm492_vm2, %v4209_v25 }
 0x390   :  { %1200 = vmatmul.mubr.f32.gmra.mxu0 %v4214_v29 }
 0x391   :  { %3142 = vmatprep.mubr.msk.f32.mxu0 %vm492_vm2, %v4216_v30 }
 0x394   :  { %1205 = vmatmul.mubr.f32.gmra.mxu0 %v4221_v31 }
 0x395   :  { %3143 = vmatprep.mubr.msk.f32.mxu0 %vm492_vm2, %v4223_v32 }
 0x398   :  { %1210 = vmatmul.mubr.f32.gmra.mxu0 %v4229_v34 }
 0x399   :  { %3144 = vmatprep.mubr.msk.f32.mxu0 %vm492_vm2, %v4232_v35 }
 0x39c   :  { %1215 = vmatmul.mubr.f32.gmra.mxu0 %v4237_v36 }
 0x39d   :  { %3145 = vmatprep.mubr.msk.f32.mxu0 %vm492_vm2, %v4239_v37 }
 0x3a0   :  { %1220 = vmatmul.mubr.f32.gmra.mxu0 %v4872_v28 }
 0x404   :  { %v1106_v54 = vpop.f32.mrf.mxu0 }
 0x405   :  { %v1107_v55 = vadd.f32 %v4397_v53, %v1106_v54 }
 0x406   :  { %v1108_v56 = vpop.f32.mrf.mxu0 }
 0x407   :  { %v1225_v57 = vmax.f32 %v1107_v55, 0.0 }
 0x408   :  { %v1111_v58 = vpop.f32.mrf.mxu0 }
 0x409   :  { %v1112_v59 = vadd.f32 %v4397_v53, %v1111_v58  ;;  %3462 = vmatprep.mubr.msk.f32.mxu1 %vm775_vm3, %v1225_v57 }
 0x40a   :  { %v1113_v60 = vpop.f32.mrf.mxu0 }
 0x40b   :  { %v1226_v61 = vmax.f32 %v1112_v59, 0.0 }
 0x40c   :  { %v1116_v62 = vpop.f32.mrf.mxu0 }
 0x40d   :  { %v1117_v63 = vadd.f32 %v4397_v53, %v1116_v62  ;;  %3463 = vmatmul.mubr.msk.f32.vlgmr.msra.gmra.mxu1 %vm775_vm3, %v1226_v61 }
 0x40e   :  { %v1118_v0 = vpop.f32.mrf.mxu0 }
 0x40f   :  { %v1227_v1 = vmax.f32 %v1117_v63, 0.0 }
 0x410   :  { %v1121_v2 = vpop.f32.mrf.mxu0 }
 0x411   :  { %v1122_v3 = vadd.f32 %v4397_v53, %v1121_v2  ;;  %3465 = vmatprep.mubr.msk.f32.mxu1 %vm775_vm3, %v1227_v1 }
 0x412   :  { %v1123_v4 = vpop.f32.mrf.mxu0 }
 0x413   :  { %v1228_v5 = vmax.f32 %v1122_v3, 0.0 }
 0x414   :  { %v1126_v6 = vpop.f32.mrf.mxu0 }
 0x415   :  { %v1127_v7 = vadd.f32 %v4397_v53, %v1126_v6  ;;  %3466 = vmatmul.mubr.msk.f32.gmra.mxu1 %vm775_vm3, %v1228_v5 }
 0x416   :  { %v1128_v8 = vpop.f32.mrf.mxu0 }
 0x417   :  { %v1229_v9 = vmax.f32 %v1127_v7, 0.0 }
 0x418   :  { %v1131_v10 = vpop.f32.mrf.mxu0 }
 0x419   :  { %v1132_v11 = vadd.f32 %v4397_v53, %v1131_v10  ;;  %3468 = vmatprep.mubr.msk.f32.mxu1 %vm775_vm3, %v1229_v9 }
 0x41a   :  { %v1133_v12 = vpop.f32.mrf.mxu0 }
 0x41b   :  { %v1230_v13 = vmax.f32 %v1132_v11, 0.0 }
 0x41c   :  { %v1136_v40 = vpop.f32.mrf.mxu0 }
 0x41d   :  { %v1137_v42 = vadd.f32 %v4397_v53, %v1136_v40  ;;  %3469 = vmatmul.mubr.msk.f32.gmra.mxu1 %vm775_vm3, %v1230_v13 }
 0x41e   :  { %v1138_v41 = vpop.f32.mrf.mxu0 }
 0x41f   :  { %v1231_v43 = vmax.f32 %v1137_v42, 0.0 }
 0x420   :  { %v1141_v47 = vpop.f32.mrf.mxu0 }
 0x421   :  { %v1142_v38 = vadd.f32 %v4397_v53, %v1141_v47  ;;  %3471 = vmatprep.mubr.msk.f32.mxu1 %vm775_vm3, %v1231_v43 }
 0x422   :  { %v1143_v51 = vpop.f32.mrf.mxu0 }
 0x423   :  { %v1232_v52 = vmax.f32 %v1142_v38, 0.0 }
 0x424   :  { %v1146_v27 = vpop.f32.mrf.mxu0 }
 0x425   :  { %v1147_v26 = vadd.f32 %v4397_v53, %v1146_v27  ;;  %3472 = vmatmul.mubr.msk.f32.gmra.mxu1 %vm775_vm3, %v1232_v52 }
 0x426   :  { %v1148_v50 = vpop.f32.mrf.mxu0 }
 0x427   :  { %v1233_v39 = vmax.f32 %v1147_v26, 0.0 }
 0x428   :  { %v1151_v46 = vpop.f32.mrf.mxu0 }
 0x429   :  { %v1152_v49 = vadd.f32 %v4397_v53, %v1151_v46  ;;  %3474 = vmatprep.mubr.msk.f32.mxu1 %vm775_vm3, %v1233_v39 }
 0x42a   :  { %v1153_v45 = vpop.f32.mrf.mxu0 }
 0x42b   :  { %v1234_v48 = vmax.f32 %v1152_v49, 0.0 }
 0x42c   :  { %v1156_v44 = vpop.f32.mrf.mxu0 }
 0x42d   :  { %v1157_v54 = vadd.f32 %v4397_v53, %v1156_v44  ;;  %3475 = vmatmul.mubr.msk.f32.gmra.mxu1 %vm775_vm3, %v1234_v48 }
 0x42e   :  { %v1158_v55 = vpop.f32.mrf.mxu0 }
 0x42f   :  { %v1235_v56 = vmax.f32 %v1157_v54, 0.0 }
 0x430   :  { %v1161_v57 = vpop.f32.mrf.mxu0 }
 0x431   :  { %v1162_v58 = vadd.f32 %v4397_v53, %v1161_v57  ;;  %3477 = vmatprep.mubr.msk.f32.mxu1 %vm775_vm3, %v1235_v56 }
 0x432   :  { %v1163_v59 = vpop.f32.mrf.mxu0 }
 0x433   :  { %v1236_v60 = vmax.f32 %v1162_v58, 0.0 }
 0x434   :  { %v1166_v61 = vpop.f32.mrf.mxu0 }
 0x435   :  { %v1167_v62 = vadd.f32 %v4397_v53, %v1166_v61  ;;  %3478 = vmatmul.mubr.msk.f32.gmra.mxu1 %vm775_vm3, %v1236_v60 }
 0x436   :  { %v1168_v63 = vpop.f32.mrf.mxu0 }
 0x437   :  { %v1237_v0 = vmax.f32 %v1167_v62, 0.0 }
 0x438   :  { %v1171_v1 = vpop.f32.mrf.mxu0 }
 0x439   :  { %v1172_v2 = vadd.f32 %v4397_v53, %v1171_v1  ;;  %3480 = vmatprep.mubr.msk.f32.mxu1 %vm775_vm3, %v1237_v0 }
 0x43a   :  { %v1173_v3 = vpop.f32.mrf.mxu0 }
 0x43b   :  { %v1238_v4 = vmax.f32 %v1172_v2, 0.0 }
 0x43c   :  { %v1176_v5 = vpop.f32.mrf.mxu0 }
 0x43d   :  { %v1177_v6 = vadd.f32 %v4397_v53, %v1176_v5  ;;  %3481 = vmatmul.mubr.msk.f32.gmra.mxu1 %vm775_vm3, %v1238_v4  ;;  %v3693_v4 = vld [vmem:[#allocation4 + $0x8] sm:$0xff] }
 0x43e   :  { %v1178_v7 = vpop.f32.mrf.mxu0 }
 0x43f   :  { %v1239_v8 = vmax.f32 %v1177_v6, 0.0 }
 0x440   :  { %v1181_v9 = vpop.f32.mrf.mxu0 }
 0x441   :  { %v1182_v10 = vadd.f32 %v4397_v53, %v1181_v9  ;;  %3483 = vmatprep.mubr.msk.f32.mxu1 %vm775_vm3, %v1239_v8 }
 0x442   :  { %v1183_v11 = vpop.f32.mrf.mxu0 }
 0x443   :  { %v1240_v12 = vmax.f32 %v1182_v10, 0.0 }
 0x444   :  { %v1186_v13 = vpop.f32.mrf.mxu0 }
 0x445   :  { %v1187_v40 = vadd.f32 %v4397_v53, %v1186_v13  ;;  %3484 = vmatmul.mubr.msk.f32.gmra.mxu1 %vm775_vm3, %v1240_v12 }
 0x446   :  { %v1188_v42 = vpop.f32.mrf.mxu0 }
 0x447   :  { %v1241_v41 = vmax.f32 %v1187_v40, 0.0 }
 0x448   :  { %v1191_v43 = vpop.f32.mrf.mxu0 }
 0x449   :  { %v1192_v47 = vadd.f32 %v4397_v53, %v1191_v43  ;;  %3486 = vmatprep.mubr.msk.f32.mxu1 %vm775_vm3, %v1241_v41 }
 0x44a   :  { %v1193_v38 = vpop.f32.mrf.mxu0 }
 0x44b   :  { %v1242_v51 = vmax.f32 %v1192_v47, 0.0 }
 0x44c   :  { %v1196_v52 = vpop.f32.mrf.mxu0 }
 0x44d   :  { %v1197_v27 = vadd.f32 %v4397_v53, %v1196_v52  ;;  %3487 = vmatmul.mubr.msk.f32.gmra.mxu1 %vm775_vm3, %v1242_v51 }
 0x44e   :  { %v1198_v26 = vpop.f32.mrf.mxu0 }
 0x44f   :  { %v1243_v50 = vmax.f32 %v1197_v27, 0.0 }
 0x450   :  { %v1201_v39 = vpop.f32.mrf.mxu0 }
 0x451   :  { %v1202_v46 = vadd.f32 %v4397_v53, %v1201_v39  ;;  %3489 = vmatprep.mubr.msk.f32.mxu1 %vm775_vm3, %v1243_v50 }
 0x452   :  { %v1203_v49 = vpop.f32.mrf.mxu0 }
 0x453   :  { %v1244_v45 = vmax.f32 %v1202_v46, 0.0 }
 0x454   :  { %v1206_v48 = vpop.f32.mrf.mxu0 }
 0x455   :  { %v1207_v44 = vadd.f32 %v4397_v53, %v1206_v48  ;;  %3490 = vmatmul.mubr.msk.f32.gmra.mxu1 %vm775_vm3, %v1244_v45  ;;  %v3694_v45 = vld [vmem:[#allocation4] sm:$0xff]  ;;  %v3695_v48 = vld [vmem:[#allocation4 + $0x18] sm:$0xff] }
 0x456   :  { %v1208_v54 = vpop.f32.mrf.mxu0 }
 0x457   :  { %v1245_v55 = vmax.f32 %v1207_v44, 0.0  ;;  %v3696_v44 = vld [vmem:[#allocation4 + $0x10] sm:$0xff]  ;;  %v3697_v54 = vld [vmem:[#allocation4 + $0x28] sm:$0xff] }
 0x458   :  { %v1211_v56 = vpop.f32.mrf.mxu0 }
 0x459   :  { %v1212_v57 = vadd.f32 %v4397_v53, %v1211_v56  ;;  %3492 = vmatprep.mubr.msk.f32.mxu1 %vm775_vm3, %v1245_v55  ;;  %v3698_v55 = vld [vmem:[#allocation4 + $0x20] sm:$0xff]  ;;  %v3699_v56 = vld [vmem:[#allocation4 + $0x38] sm:$0xff] }
 0x45a   :  { %v1213_v58 = vpop.f32.mrf.mxu0 }
 0x45b   :  { %v1246_v59 = vmax.f32 %v1212_v57, 0.0  ;;  %v3700_v57 = vld [vmem:[#allocation4 + $0x30] sm:$0xff]  ;;  %v3701_v58 = vld [vmem:[#allocation4 + $0x48] sm:$0xff] }
 0x45c   :  { %v1216_v60 = vpop.f32.mrf.mxu0 }
 0x45d   :  { %v1217_v61 = vadd.f32 %v4397_v53, %v1216_v60  ;;  %3493 = vmatmul.mubr.msk.f32.gmra.mxu1 %vm775_vm3, %v1246_v59  ;;  %v3702_v59 = vld [vmem:[#allocation4 + $0x40] sm:$0xff]  ;;  %v3703_v60 = vld [vmem:[#allocation4 + $0x58] sm:$0xff] }
 0x45e   :  { %v1218_v62 = vpop.f32.mrf.mxu0 }
 0x45f   :  { %v1247_v63 = vmax.f32 %v1217_v61, 0.0  ;;  %v3704_v61 = vld [vmem:[#allocation4 + $0x50] sm:$0xff]  ;;  %v3705_v62 = vld [vmem:[#allocation4 + $0x68] sm:$0xff] }
 0x460   :  { %v1221_v0 = vpop.f32.mrf.mxu0 }
 0x461   :  { %v1222_v1 = vadd.f32 %v4397_v53, %v1221_v0  ;;  %3495 = vmatprep.mubr.msk.f32.mxu1 %vm775_vm3, %v1247_v63  ;;  %v3706_v63 = vld [vmem:[#allocation4 + $0x60] sm:$0xff]  ;;  %v3707_v0 = vld [vmem:[#allocation4 + $0x78] sm:$0xff] }
 0x462   :  { %v1223_v2 = vpop.f32.mrf.mxu0 }
 0x463   :  { %v1248_v3 = vmax.f32 %v1222_v1, 0.0  ;;  %v3708_v1 = vld [vmem:[#allocation4 + $0x70] sm:$0xff]  ;;  %v3709_v2 = vld [vmem:[#allocation4 + $0x88] sm:$0xff] }
 0x465   :  { %3496 = vmatmul.mubr.msk.f32.gmra.mxu1 %vm775_vm3, %v1248_v3  ;;  %v3710_v3 = vld [vmem:[#allocation4 + $0x80] sm:$0xff] }
 0x466   :  { %3171 = vmatprep.mubr.msk.f32.mxu1 %vm492_vm2, %v3693_v4  ;;  %v3711_v4 = vld [vmem:[#allocation4 + $0x98] sm:$0xff] }
 0x4cd   :  { %v3464_v5 = vpop.f32.mrf.mxu1 }
 0x4cf   :  { %v1388_v6 = vpop.f32.mrf.mxu1 }
 0x4d5   :  { %v3467_v7 = vpop.f32.mrf.mxu1 }
 0x4d7   :  { %v1398_v8 = vpop.f32.mrf.mxu1 }
 0x4dd   :  { %v3470_v9 = vpop.f32.mrf.mxu1 }
 0x4df   :  { %v1408_v10 = vpop.f32.mrf.mxu1 }
 0x4e5   :  { %v3473_v11 = vpop.f32.mrf.mxu1 }
 0x4e7   :  { %v1418_v12 = vpop.f32.mrf.mxu1 }
 0x4ed   :  { %v3476_v13 = vpop.f32.mrf.mxu1 }
 0x4ef   :  { %v1428_v40 = vpop.f32.mrf.mxu1 }
 0x4f5   :  { %v3479_v53 = vpop.f32.mrf.mxu1 }
 0x4f7   :  { %v1438_v42 = vpop.f32.mrf.mxu1 }
 0x4fd   :  { %v3482_v41 = vpop.f32.mrf.mxu1 }
 0x4ff   :  { %v1448_v43 = vpop.f32.mrf.mxu1 }
 0x505   :  { %v3485_v47 = vpop.f32.mrf.mxu1 }
 0x506   :  { %1515 = vmatpush1.msra.mxu1 %v3485_v47 }
 0x507   :  { %v1458_v38 = vpop.f32.mrf.mxu1  ;;  %1516 = vmatprep.subr.mxu1 %v4871_v33 }
 0x508   :  { %1517 = vmatpush1.msra.mxu1 %v1458_v38 }
 0x509   :  { %1518 = vmatprep.subr.mxu1 %v4871_v33 }
 0x50a   :  { %1519 = vmatpush1.msra.mxu1 %v3482_v41 }
 0x50b   :  { %1520 = vmatprep.subr.mxu1 %v4871_v33 }
 0x50c   :  { %1521 = vmatpush1.msra.mxu1 %v1448_v43 }
 0x50d   :  { %1522 = vmatprep.subr.mxu1 %v4871_v33  ;;  %v3488_v51 = vpop.f32.mrf.mxu1 }
 0x50e   :  { %1523 = vmatpush1.msra.mxu1 %v3479_v53 }
 0x50f   :  { %1524 = vmatprep.subr.mxu1 %v4871_v33  ;;  %v1468_v52 = vpop.f32.mrf.mxu1 }
 0x510   :  { %1525 = vmatpush1.msra.mxu1 %v1438_v42 }
 0x511   :  { %1526 = vmatprep.subr.mxu1 %v4871_v33 }
 0x512   :  { %1527 = vmatpush1.msra.mxu1 %v3476_v13 }
 0x513   :  { %1528 = vmatprep.subr.mxu1 %v4871_v33 }
 0x514   :  { %1529 = vmatpush1.msra.mxu1 %v1428_v40 }
 0x515   :  { %1530 = vmatprep.subr.mxu1 %v4871_v33  ;;  %v3491_v27 = vpop.f32.mrf.mxu1 }
 0x516   :  { %1531 = vmatpush1.msra.mxu1 %v3473_v11  ;;  %v3718_v11 = vld [vmem:[#allocation4 + $0xc0] sm:$0xff] }
 0x517   :  { %1532 = vmatprep.subr.mxu1 %v4871_v33  ;;  %v1478_v26 = vpop.f32.mrf.mxu1 }
 0x518   :  { %1533 = vmatpush1.msra.mxu1 %v1418_v12  ;;  %v3719_v12 = vld [vmem:[#allocation4 + $0xd8] sm:$0xff] }
 0x519   :  { %1534 = vmatprep.subr.mxu1 %v4871_v33 }
 0x51a   :  { %1535 = vmatpush1.msra.mxu1 %v3470_v9  ;;  %v3716_v9 = vld [vmem:[#allocation4 + $0xb0] sm:$0xff] }
 0x51b   :  { %1536 = vmatprep.subr.mxu1 %v4871_v33 }
 0x51c   :  { %1537 = vmatpush1.msra.mxu1 %v1408_v10  ;;  %v3717_v10 = vld [vmem:[#allocation4 + $0xc8] sm:$0xff] }
 0x51d   :  { %1538 = vmatprep.subr.mxu1 %v4871_v33  ;;  %v3494_v50 = vpop.f32.mrf.mxu1 }
 0x51e   :  { %1539 = vmatpush1.msra.mxu1 %v3467_v7  ;;  %v3714_v7 = vld [vmem:[#allocation4 + $0xa0] sm:$0xff] }
 0x51f   :  { %1540 = vmatprep.subr.mxu1 %v4871_v33  ;;  %v1488_v39 = vpop.f32.mrf.mxu1 }
 0x520   :  { %1541 = vmatpush1.msra.mxu1 %v1398_v8  ;;  %v3715_v8 = vld [vmem:[#allocation4 + $0xb8] sm:$0xff] }
 0x521   :  { %1542 = vmatprep.subr.mxu1 %v4871_v33 }
 0x522   :  { %1543 = vmatpush1.msra.mxu1 %v3464_v5  ;;  %v3712_v5 = vld [vmem:[#allocation4 + $0x90] sm:$0xff] }
 0x523   :  { %1544 = vmatprep.subr.mxu1 %v4871_v33 }
 0x524   :  { %1545 = vmatpush1.msra.mxu1 %v1388_v6  ;;  %v3713_v6 = vld [vmem:[#allocation4 + $0xa8] sm:$0xff] }
 0x525   :  { %v3497_v46 = vpop.f32.mrf.mxu1  ;;  %1562 = vmatprep.subr.mxu1 %v4871_v33 }
 0x526   :  { %1563 = vmatpush2.msra.mxu1 %v3497_v46 }
 0x527   :  { %v1498_v49 = vpop.f32.mrf.mxu1  ;;  %1564 = vmatprep.subr.mxu1 %v4871_v33 }
 0x528   :  { %1565 = vmatpush2.msra.mxu1 %v1498_v49 }
 0x529   :  { %1566 = vmatprep.subr.mxu1 %v4871_v33 }
 0x52a   :  { %1567 = vmatpush2.msra.mxu1 %v3494_v50 }
 0x52b   :  { %1568 = vmatprep.subr.mxu1 %v4871_v33 }
 0x52c   :  { %1569 = vmatpush2.msra.mxu1 %v1488_v39 }
 0x52d   :  { %1570 = vmatprep.subr.mxu1 %v4871_v33 }
 0x52e   :  { %1571 = vmatpush2.msra.mxu1 %v3491_v27 }
 0x52f   :  { %1572 = vmatprep.subr.mxu1 %v4871_v33 }
 0x530   :  { %1573 = vmatpush2.msra.mxu1 %v1478_v26 }
 0x531   :  { %1574 = vmatprep.subr.mxu1 %v4871_v33 }
 0x532   :  { %1575 = vmatpush2.msra.mxu1 %v3488_v51 }
 0x533   :  { %1576 = vmatprep.subr.mxu1 %v4871_v33 }
 0x534   :  { %1577 = vmatpush2.msra.mxu1 %v1468_v52 }
 0x535   :  { %1579 = vmatmul.mubr.f32.vlgmr.msra.gmra.mxu1 %v3694_v45 }
 0x536   :  { %3172 = vmatprep.mubr.msk.f32.mxu1 %vm492_vm2, %v3695_v48 }
 0x539   :  { %1584 = vmatmul.mubr.f32.gmra.mxu1 %v3696_v44 }
 0x53a   :  { %3173 = vmatprep.mubr.msk.f32.mxu1 %vm492_vm2, %v3697_v54 }
 0x53d   :  { %1589 = vmatmul.mubr.f32.gmra.mxu1 %v3698_v55 }
 0x53e   :  { %3174 = vmatprep.mubr.msk.f32.mxu1 %vm492_vm2, %v3699_v56 }
 0x541   :  { %1594 = vmatmul.mubr.f32.gmra.mxu1 %v3700_v57 }
 0x542   :  { %3175 = vmatprep.mubr.msk.f32.mxu1 %vm492_vm2, %v3701_v58 }
 0x545   :  { %1599 = vmatmul.mubr.f32.gmra.mxu1 %v3702_v59 }
 0x546   :  { %3176 = vmatprep.mubr.msk.f32.mxu1 %vm492_vm2, %v3703_v60 }
 0x549   :  { %1604 = vmatmul.mubr.f32.gmra.mxu1 %v3704_v61 }
 0x54a   :  { %3177 = vmatprep.mubr.msk.f32.mxu1 %vm492_vm2, %v3705_v62 }
 0x54d   :  { %1609 = vmatmul.mubr.f32.gmra.mxu1 %v3706_v63 }
 0x54e   :  { %3178 = vmatprep.mubr.msk.f32.mxu1 %vm492_vm2, %v3707_v0 }
 0x551   :  { %1614 = vmatmul.mubr.f32.gmra.mxu1 %v3708_v1 }
 0x552   :  { %3179 = vmatprep.mubr.msk.f32.mxu1 %vm492_vm2, %v3709_v2 }
 0x555   :  { %1619 = vmatmul.mubr.f32.gmra.mxu1 %v3710_v3 }
 0x556   :  { %3180 = vmatprep.mubr.msk.f32.mxu1 %vm492_vm2, %v3711_v4 }
 0x559   :  { %1624 = vmatmul.mubr.f32.gmra.mxu1 %v3712_v5 }
 0x55a   :  { %3181 = vmatprep.mubr.msk.f32.mxu1 %vm492_vm2, %v3713_v6 }
 0x55d   :  { %1629 = vmatmul.mubr.f32.gmra.mxu1 %v3714_v7 }
 0x55e   :  { %3182 = vmatprep.mubr.msk.f32.mxu1 %vm492_vm2, %v3715_v8 }
 0x561   :  { %1634 = vmatmul.mubr.f32.gmra.mxu1 %v3716_v9 }
 0x562   :  { %3183 = vmatprep.mubr.msk.f32.mxu1 %vm492_vm2, %v3717_v10 }
 0x565   :  { %1639 = vmatmul.mubr.f32.gmra.mxu1 %v3718_v11 }
 0x566   :  { %3184 = vmatprep.mubr.msk.f32.mxu1 %vm492_vm2, %v3719_v12 }
 0x569   :  { %1644 = vmatmul.mubr.f32.gmra.mxu1 %v4172_v14  ;;  %v4516_v14 = vld [vmem:[%s3827_s3] ss:$0 sm:$0xff]  ;;  %s4883_s3 = sld [smem:[#allocation12_spill]] }
 0x56a   :  { %3185 = vmatprep.mubr.msk.f32.mxu1 %vm492_vm2, %v4174_v15 }
 0x56d   :  { %1649 = vmatmul.mubr.f32.gmra.mxu1 %v4179_v16 }
 0x56e   :  { %3186 = vmatprep.mubr.msk.f32.mxu1 %vm492_vm2, %v4181_v17 }
 0x571   :  { %1654 = vmatmul.mubr.f32.gmra.mxu1 %v4186_v18 }
 0x572   :  { %3187 = vmatprep.mubr.msk.f32.mxu1 %vm492_vm2, %v4188_v19 }
 0x575   :  { %1659 = vmatmul.mubr.f32.gmra.mxu1 %v4193_v20 }
 0x576   :  { %3188 = vmatprep.mubr.msk.f32.mxu1 %vm492_vm2, %v4195_v21 }
 0x579   :  { %1664 = vmatmul.mubr.f32.gmra.mxu1 %v4200_v22 }
 0x57a   :  { %3189 = vmatprep.mubr.msk.f32.mxu1 %vm492_vm2, %v4202_v23 }
 0x57d   :  { %1669 = vmatmul.mubr.f32.gmra.mxu1 %v4207_v24 }
 0x57e   :  { %3190 = vmatprep.mubr.msk.f32.mxu1 %vm492_vm2, %v4209_v25 }
 0x581   :  { %1674 = vmatmul.mubr.f32.gmra.mxu1 %v4214_v29 }
 0x582   :  { %3191 = vmatprep.mubr.msk.f32.mxu1 %vm492_vm2, %v4216_v30 }
 0x585   :  { %1679 = vmatmul.mubr.f32.gmra.mxu1 %v4221_v31 }
 0x586   :  { %3192 = vmatprep.mubr.msk.f32.mxu1 %vm492_vm2, %v4223_v32 }
 0x589   :  { %1684 = vmatmul.mubr.f32.gmra.mxu1 %v4229_v34 }
 0x58a   :  { %3193 = vmatprep.mubr.msk.f32.mxu1 %vm492_vm2, %v4232_v35 }
 0x58d   :  { %1689 = vmatmul.mubr.f32.gmra.mxu1 %v4237_v36 }
 0x58e   :  { %3194 = vmatprep.mubr.msk.f32.mxu1 %vm492_vm2, %v4239_v37 }
 0x591   :  { %1694 = vmatmul.mubr.f32.gmra.mxu1 %v4872_v28 }
 0x5f5   :  { %v1580_v15 = vpop.f32.mrf.mxu1 }
 0x5f6   :  { %v1581_v16 = vadd.f32 %v4516_v14, %v1580_v15 }
 0x5f7   :  { %v1582_v17 = vpop.f32.mrf.mxu1 }
 0x5f8   :  { %v1699_v18 = vmax.f32 %v1581_v16, 0.0 }
 0x5f9   :  { %v1585_v19 = vpop.f32.mrf.mxu1 }
 0x5fa   :  { %1723 = vst.msk [vmem:[#allocation2] sm:$0xff] %vm775_vm3, %v1699_v18  ;;  %v1586_v20 = vadd.f32 %v4516_v14, %v1585_v19 }
 0x5fb   :  { %v1587_v21 = vpop.f32.mrf.mxu1 }
 0x5fc   :  { %v1700_v22 = vmax.f32 %v1586_v20, 0.0 }
 0x5fd   :  { %v1590_v23 = vpop.f32.mrf.mxu1 }
 0x5fe   :  { %1724 = vst.msk [vmem:[#allocation2 + $0x8] sm:$0xff] %vm775_vm3, %v1700_v22  ;;  %v1591_v24 = vadd.f32 %v4516_v14, %v1590_v23 }
 0x5ff   :  { %v1592_v25 = vpop.f32.mrf.mxu1 }
 0x600   :  { %v1701_v29 = vmax.f32 %v1591_v24, 0.0 }
 0x601   :  { %v1595_v30 = vpop.f32.mrf.mxu1 }
 0x602   :  { %1725 = vst.msk [vmem:[#allocation2 + $0x10] sm:$0xff] %vm775_vm3, %v1701_v29  ;;  %v1596_v31 = vadd.f32 %v4516_v14, %v1595_v30 }
 0x603   :  { %v1597_v32 = vpop.f32.mrf.mxu1 }
 0x604   :  { %v1702_v34 = vmax.f32 %v1596_v31, 0.0 }
 0x605   :  { %v1600_v35 = vpop.f32.mrf.mxu1 }
 0x606   :  { %1726 = vst.msk [vmem:[#allocation2 + $0x18] sm:$0xff] %vm775_vm3, %v1702_v34  ;;  %v1601_v36 = vadd.f32 %v4516_v14, %v1600_v35 }
 0x607   :  { %v1602_v37 = vpop.f32.mrf.mxu1 }
 0x608   :  { %v1703_v28 = vmax.f32 %v1601_v36, 0.0 }
 0x609   :  { %v1605_v13 = vpop.f32.mrf.mxu1 }
 0x60a   :  { %1727 = vst.msk [vmem:[#allocation2 + $0x20] sm:$0xff] %vm775_vm3, %v1703_v28  ;;  %v1606_v40 = vadd.f32 %v4516_v14, %v1605_v13 }
 0x60b   :  { %v1607_v53 = vpop.f32.mrf.mxu1 }
 0x60c   :  { %v1704_v42 = vmax.f32 %v1606_v40, 0.0 }
 0x60d   :  { %v1610_v41 = vpop.f32.mrf.mxu1 }
 0x60e   :  { %1728 = vst.msk [vmem:[#allocation2 + $0x28] sm:$0xff] %vm775_vm3, %v1704_v42  ;;  %v1611_v43 = vadd.f32 %v4516_v14, %v1610_v41 }
 0x60f   :  { %v1612_v47 = vpop.f32.mrf.mxu1 }
 0x610   :  { %v1705_v38 = vmax.f32 %v1611_v43, 0.0 }
 0x611   :  { %v1615_v51 = vpop.f32.mrf.mxu1 }
 0x612   :  { %1729 = vst.msk [vmem:[#allocation2 + $0x30] sm:$0xff] %vm775_vm3, %v1705_v38  ;;  %v1616_v52 = vadd.f32 %v4516_v14, %v1615_v51 }
 0x613   :  { %v1617_v27 = vpop.f32.mrf.mxu1 }
 0x614   :  { %v1706_v26 = vmax.f32 %v1616_v52, 0.0 }
 0x615   :  { %v1620_v50 = vpop.f32.mrf.mxu1 }
 0x616   :  { %1730 = vst.msk [vmem:[#allocation2 + $0x38] sm:$0xff] %vm775_vm3, %v1706_v26  ;;  %v1621_v39 = vadd.f32 %v4516_v14, %v1620_v50 }
 0x617   :  { %v1622_v46 = vpop.f32.mrf.mxu1 }
 0x618   :  { %v1707_v49 = vmax.f32 %v1621_v39, 0.0 }
 0x619   :  { %v1625_v45 = vpop.f32.mrf.mxu1 }
 0x61a   :  { %1731 = vst.msk [vmem:[#allocation2 + $0x40] sm:$0xff] %vm775_vm3, %v1707_v49  ;;  %v1626_v48 = vadd.f32 %v4516_v14, %v1625_v45 }
 0x61b   :  { %v1627_v44 = vpop.f32.mrf.mxu1 }
 0x61c   :  { %v1708_v54 = vmax.f32 %v1626_v48, 0.0 }
 0x61d   :  { %v1630_v55 = vpop.f32.mrf.mxu1 }
 0x61e   :  { %1732 = vst.msk [vmem:[#allocation2 + $0x48] sm:$0xff] %vm775_vm3, %v1708_v54  ;;  %v1631_v56 = vadd.f32 %v4516_v14, %v1630_v55 }
 0x61f   :  { %v1632_v57 = vpop.f32.mrf.mxu1 }
 0x620   :  { %v1709_v58 = vmax.f32 %v1631_v56, 0.0 }
 0x621   :  { %v1635_v59 = vpop.f32.mrf.mxu1 }
 0x622   :  { %1733 = vst.msk [vmem:[#allocation2 + $0x50] sm:$0xff] %vm775_vm3, %v1709_v58  ;;  %v1636_v60 = vadd.f32 %v4516_v14, %v1635_v59 }
 0x623   :  { %v1637_v61 = vpop.f32.mrf.mxu1 }
 0x624   :  { %v1710_v62 = vmax.f32 %v1636_v60, 0.0 }
 0x625   :  { %v1640_v63 = vpop.f32.mrf.mxu1 }
 0x626   :  { %1734 = vst.msk [vmem:[#allocation2 + $0x58] sm:$0xff] %vm775_vm3, %v1710_v62  ;;  %v1641_v0 = vadd.f32 %v4516_v14, %v1640_v63 }
 0x627   :  { %v1642_v1 = vpop.f32.mrf.mxu1 }
 0x628   :  { %v1711_v2 = vmax.f32 %v1641_v0, 0.0 }
 0x629   :  { %v1645_v3 = vpop.f32.mrf.mxu1 }
 0x62a   :  { %1735 = vst.msk [vmem:[#allocation2 + $0x60] sm:$0xff] %vm775_vm3, %v1711_v2  ;;  %v1646_v4 = vadd.f32 %v4516_v14, %v1645_v3 }
 0x62b   :  { %v1647_v5 = vpop.f32.mrf.mxu1 }
 0x62c   :  { %v1712_v6 = vmax.f32 %v1646_v4, 0.0 }
 0x62d   :  { %v1650_v7 = vpop.f32.mrf.mxu1  ;;  %v1751_v59 = vld [vmem:[#allocation2 + $0x40] ss:$4 sm:$0xff]  ;;  %v1763_v60 = vld [vmem:[#allocation2 + $0x41] ss:$4 sm:$0xff] }
 0x62e   :  { %1736 = vst.msk [vmem:[#allocation2 + $0x68] sm:$0xff] %vm775_vm3, %v1712_v6  ;;  %v1651_v8 = vadd.f32 %v4516_v14, %v1650_v7  ;;  %v1796_v4 = vadd.f32 %v1763_v60, %v1751_v59  ;;  %v1749_v6 = vld [vmem:[#allocation2 + $0x20] ss:$4 sm:$0xff]  ;;  %v1761_v7 = vld [vmem:[#allocation2 + $0x21] ss:$4 sm:$0xff] }
 0x62f   :  { %v1652_v9 = vpop.f32.mrf.mxu1 }
 0x630   :  { %v1713_v10 = vmax.f32 %v1651_v8, 0.0  ;;  %v1775_v9 = vld [vmem:[#allocation2 + $0x42] ss:$4 sm:$0xff] }
 0x631   :  { %v1655_v11 = vpop.f32.mrf.mxu1 }
 0x632   :  { %1737 = vst.msk [vmem:[#allocation2 + $0x70] sm:$0xff] %vm775_vm3, %v1713_v10  ;;  %v1656_v12 = vadd.f32 %v4516_v14, %v1655_v11  ;;  %v1808_v11 = vadd.f32 %v1796_v4, %v1775_v9 }
 0x633   :  { %v1657_v15 = vpop.f32.mrf.mxu1 }
 0x634   :  { %v1714_v16 = vmax.f32 %v1656_v12, 0.0  ;;  %v1795_v12 = vadd.f32 %v1761_v7, %v1749_v6  ;;  %v1747_v15 = vld [vmem:[#allocation2] ss:$4 sm:$0xff] }
 0x635   :  { %v1660_v17 = vpop.f32.mrf.mxu1 }
 0x636   :  { %1738 = vst.msk [vmem:[#allocation2 + $0x78] sm:$0xff] %vm775_vm3, %v1714_v16  ;;  %v1661_v18 = vadd.f32 %v4516_v14, %v1660_v17  ;;  %v1759_v16 = vld [vmem:[#allocation2 + $0x1] ss:$4 sm:$0xff]  ;;  %v1773_v17 = vld [vmem:[#allocation2 + $0x22] ss:$4 sm:$0xff] }
 0x637   :  { %v1662_v19 = vpop.f32.mrf.mxu1 }
 0x638   :  { %v1715_v20 = vmax.f32 %v1661_v18, 0.0  ;;  %v1807_v19 = vadd.f32 %v1795_v12, %v1773_v17  ;;  %v1954_v12 = vld [vmem:[%s3832_s8 + $0x8] sm:$0xff] }
 0x639   :  { %v1665_v21 = vpop.f32.mrf.mxu1  ;;  %3219 = vmatprep.mubr.msk.f32.mxu0 %vm1890_vm4, %v1954_v12 }
 0x63a   :  { %1739 = vst.msk [vmem:[#allocation2 + $0x80] sm:$0xff] %vm775_vm3, %v1715_v20  ;;  %v1666_v22 = vadd.f32 %v4516_v14, %v1665_v21  ;;  %v1794_v20 = vadd.f32 %v1759_v16, %v1747_v15  ;;  %v1771_v21 = vld [vmem:[#allocation2 + $0x2] ss:$4 sm:$0xff] }
 0x63b   :  { %v1667_v23 = vpop.f32.mrf.mxu1 }
 0x63c   :  { %v1716_v24 = vmax.f32 %v1666_v22, 0.0  ;;  %v1785_v22 = vld [vmem:[#allocation2 + $0x23] ss:$4 sm:$0xff] }
 0x63d   :  { %v1670_v25 = vpop.f32.mrf.mxu1  ;;  %v1753_v29 = vld [vmem:[#allocation2 + $0x60] ss:$4 sm:$0xff]  ;;  %v1765_v30 = vld [vmem:[#allocation2 + $0x61] ss:$4 sm:$0xff]  ;;  %v1777_v36 = vld [vmem:[#allocation2 + $0x62] ss:$4 sm:$0xff] }
 0x63e   :  { %1740 = vst.msk [vmem:[#allocation2 + $0x88] sm:$0xff] %vm775_vm3, %v1716_v24  ;;  %v1671_v31 = vadd.f32 %v4516_v14, %v1670_v25  ;;  %v1803_v32 = vmax.f32 %v1753_v29, %v1765_v30  ;;  %v1797_v34 = vadd.f32 %v1765_v30, %v1753_v29  ;;  %v1789_v53 = vld [vmem:[#allocation2 + $0x63] ss:$4 sm:$0xff]  ;;  %v1819_v25 = vadd.f32 %v1807_v19, %v1785_v22 }
 0x63f   :  { %v1672_v35 = vpop.f32.mrf.mxu1  ;;  %v1806_v30 = vadd.f32 %v1794_v20, %v1771_v21 }
 0x640   :  { %v1717_v37 = vmax.f32 %v1671_v31, 0.0  ;;  %v1815_v28 = vmax.f32 %v1803_v32, %v1777_v36  ;;  %v1809_v13 = vadd.f32 %v1797_v34, %v1777_v36  ;;  %v1783_v36 = vld [vmem:[#allocation2 + $0x3] ss:$4 sm:$0xff] }
 0x641   :  { %v1675_v40 = vpop.f32.mrf.mxu1 }
 0x642   :  { %1741 = vst.msk [vmem:[#allocation2 + $0x90] sm:$0xff] %vm775_vm3, %v1717_v37  ;;  %v1676_v42 = vadd.f32 %v4516_v14, %v1675_v40  ;;  %v1827_v41 = vmax.f32 %v1815_v28, %v1789_v53  ;;  %v4557_v43 = vadd.f32 %v1809_v13, %v1789_v53  ;;  %v1802_v37 = vmax.f32 %v1751_v59, %v1763_v60 }
 0x643   :  { %v1677_v47 = vpop.f32.mrf.mxu1  ;;  %v1818_v13 = vadd.f32 %v1806_v30, %v1783_v36 }
 0x644   :  { %v1718_v38 = vmax.f32 %v1676_v42, 0.0  ;;  %1848 = vrot.lane.b32.xlu0 %v1827_v41, %s3778_s0  ;;  %1872 = vrot.lane.b32.xlu1 %v4557_v43, %s3776_s10  ;;  %v1814_v53 = vmax.f32 %v1802_v37, %v1775_v9  ;;  %v1801_v42 = vmax.f32 %v1749_v6, %v1761_v7 }
 0x645   :  { %v1680_v51 = vpop.f32.mrf.mxu1  ;;  %v1830_v7 = vmul.f32 0.25, %v1818_v13 }
 0x646   :  { %1742 = vst.msk [vmem:[#allocation2 + $0x98] sm:$0xff] %vm775_vm3, %v1718_v38  ;;  %v1681_v52 = vadd.f32 %v4516_v14, %v1680_v51  ;;  %v1813_v38 = vmax.f32 %v1801_v42, %v1773_v17  ;;  %v1800_v51 = vmax.f32 %v1747_v15, %v1759_v16  ;;  %v3781_v15 = vmov 0   ;;  %v1955_v16 = vld [vmem:[%s3837_s14] sm:$0xff]  ;;  %s4887_s14 = sld [smem:[#allocation14_spill]] }
 0x647   :  { %v1682_v27 = vpop.f32.mrf.mxu1  ;;  %3691 = vset.pattern.permute.xlu0 %v3781_v15  ;;  %3692 = vset.pattern.permute.xlu1 %v3781_v15 }
 0x648   :  { %v1719_v26 = vmax.f32 %v1681_v52, 0.0  ;;  %v1825_v52 = vmax.f32 %v1813_v38, %v1785_v22  ;;  %v1812_v27 = vmax.f32 %v1800_v51, %v1771_v21  ;;  %v2126_v38 = vld [vmem:[%s3852_s30] sm:$0xff]  ;;  %s4890_s30 = sld [smem:[#allocation15_spill]] }
 0x649   :  { %v1685_v50 = vpop.f32.mrf.mxu1 }
 0x64a   :  { %1743 = vst.msk [vmem:[#allocation2 + $0xa0] sm:$0xff] %vm775_vm3, %v1719_v26  ;;  %v1686_v39 = vadd.f32 %v4516_v14, %v1685_v50  ;;  %v1824_v26 = vmax.f32 %v1812_v27, %v1783_v36  ;;  %v1833_v50 = vmul.f32 0.25, %v4557_v43 }
 0x64b   :  { %v1687_v46 = vpop.f32.mrf.mxu1 }
 0x64c   :  { %v1720_v49 = vmax.f32 %v1686_v39, 0.0 }
 0x64d   :  { %v1690_v45 = vpop.f32.mrf.mxu1  ;;  %v1755_v48 = vld [vmem:[#allocation2 + $0x80] ss:$4 sm:$0xff]  ;;  %v1767_v44 = vld [vmem:[#allocation2 + $0x81] ss:$4 sm:$0xff]  ;;  %v1779_v58 = vld [vmem:[#allocation2 + $0x82] ss:$4 sm:$0xff] }
 0x64e   :  { %1744 = vst.msk [vmem:[#allocation2 + $0xa8] sm:$0xff] %vm775_vm3, %v1720_v49  ;;  %v1691_v54 = vadd.f32 %v4516_v14, %v1690_v45  ;;  %v1804_v55 = vmax.f32 %v1755_v48, %v1767_v44  ;;  %v1798_v56 = vadd.f32 %v1767_v44, %v1755_v48  ;;  %v1791_v0 = vld [vmem:[#allocation2 + $0x83] ss:$4 sm:$0xff] }
 0x64f   :  { %v1692_v57 = vpop.f32.mrf.mxu1 }
 0x650   :  { %v1721_v61 = vmax.f32 %v1691_v54, 0.0  ;;  %v1816_v62 = vmax.f32 %v1804_v55, %v1779_v58  ;;  %v1810_v3 = vadd.f32 %v1798_v56, %v1779_v58 }
 0x651   :  { %v1695_v63 = vpop.f32.mrf.mxu1 }
 0x652   :  { %1745 = vst.msk [vmem:[#allocation2 + $0xb0] sm:$0xff] %vm775_vm3, %v1721_v61  ;;  %v1696_v1 = vadd.f32 %v4516_v14, %v1695_v63  ;;  %v1828_v2 = vmax.f32 %v1816_v62, %v1791_v0  ;;  %v1822_v10 = vadd.f32 %v1810_v3, %v1791_v0  ;;  %v1787_v14 = vld [vmem:[#allocation2 + $0x43] ss:$4 sm:$0xff] }
 0x653   :  { %v1697_v5 = vpop.f32.mrf.mxu1  ;;  %v1820_v18 = vadd.f32 %v1808_v11, %v1787_v14  ;;  %v1826_v47 = vmax.f32 %v1814_v53, %v1787_v14  ;;  %v2045_v14 = vld [vmem:[%s3847_s24] sm:$0xff]  ;;  %s4889_s24 = sld [smem:[#allocation16_spill]] }
 0x654   :  { %v1722_v8 = vmax.f32 %v1696_v1, 0.0  ;;  %1850 = vrot.lane.b32.xlu1 %v1828_v2, %s3778_s0  ;;  %v1834_v44 = vmul.f32 0.25, %v1822_v10  ;;  %v1831_v2 = vmul.f32 0.25, %v1819_v25  ;;  %v2127_v53 = vld [vmem:[%s3857_s6] sm:$0xff]  ;;  %s4893_s6 = sld [smem:[#allocation18_spill]] }
 0x655   :  { %v1832_v62 = vmul.f32 0.25, %v1820_v18 }
 0x656   :  { %1746 = vst.msk [vmem:[#allocation2 + $0xb8] sm:$0xff] %vm775_vm3, %v1722_v8 }
 0x658   :  { %1874 = vrot.lane.b32.xlu1 %v1822_v10, %s3776_s10 }
 0x65c   :  { %1870 = vrot.lane.b32.xlu1 %v1820_v18, %s3776_s10 }
 0x65d   :  { %v1757_v23 = vld [vmem:[#allocation2 + $0xa0] ss:$4 sm:$0xff]  ;;  %v1769_v24 = vld [vmem:[#allocation2 + $0xa1] ss:$4 sm:$0xff]  ;;  %v1781_v32 = vld [vmem:[#allocation2 + $0xa2] ss:$4 sm:$0xff] }
 0x65e   :  { %v1805_v29 = vmax.f32 %v1757_v23, %v1769_v24  ;;  %v1799_v31 = vadd.f32 %v1769_v24, %v1757_v23  ;;  %v1793_v35 = vld [vmem:[#allocation2 + $0xa3] ss:$4 sm:$0xff] }
 0x660   :  { %1868 = vrot.lane.b32.xlu1 %v1819_v25, %s3776_s10  ;;  %v1817_v34 = vmax.f32 %v1805_v29, %v1781_v32  ;;  %v1811_v40 = vadd.f32 %v1799_v31, %v1781_v32 }
 0x662   :  { %v1829_v28 = vmax.f32 %v1817_v34, %v1793_v35  ;;  %v1823_v41 = vadd.f32 %v1811_v40, %v1793_v35  ;;  %v1953_v35 = vld [vmem:[%s3832_s8] sm:$0xff]  ;;  %s4884_s8 = sld [smem:[#allocation11_spill]] }
 0x664   :  { %1852 = vrot.lane.b32.xlu0 %v1829_v28, %s3778_s0  ;;  %1866 = vrot.lane.b32.xlu1 %v1818_v13, %s3776_s10  ;;  %v1835_v57 = vmul.f32 0.25, %v1823_v41 }
 0x668   :  { %1876 = vrot.lane.b32.xlu0 %v1823_v41, %s3776_s10  ;;  %v2044_v41 = vld [vmem:[%s3842_s19] sm:$0xff]  ;;  %s4888_s19 = sld [smem:[#allocation13_spill]] }
 0x669   :  { %v2400_v15 = vld [vmem:[%s4884_s8] sm:$0xff] }
 0x66c   :  { %1846 = vrot.lane.b32.xlu0 %v1826_v47, %s3778_s0 }
 0x670   :  { %1844 = vrot.lane.b32.xlu0 %v1825_v52, %s3778_s0 }
 0x674   :  { %1842 = vrot.lane.b32.xlu0 %v1824_v26, %s3778_s0 }
 0x6b6   :  { %v1849_v39 = vpop.permute.xlu0 %1848  ;;  %v1873_v46 = vpop.permute.xlu1 %1872 }
 0x6b7   :  { %v1887_v49 = vsel %vm775_vm3, %v1833_v50, %v1849_v39 }
 0x6b8   :  { %v4584_v45 = vsel %vm1890_vm4, %v1887_v49, %v1873_v46 }
 0x6b9   :  { %1965 = vmatpush1.msra.mxu0 %v4584_v45 }
 0x6ba   :  { %1966 = vmatprep.subr.mxu0 %v4871_v33 }
 0x6c6   :  { %v1851_v48 = vpop.permute.xlu1 %1850 }
 0x6c7   :  { %v1888_v54 = vsel %vm775_vm3, %v1834_v44, %v1851_v48 }
 0x6ca   :  { %v1875_v55 = vpop.permute.xlu1 %1874 }
 0x6cb   :  { %v4590_v56 = vsel %vm1890_vm4, %v1888_v54, %v1875_v55  ;;  %v2219_v54 = vld [vmem:[%s4877_s13] sm:$0xff] }
 0x6cc   :  { %1936 = vrot.lane.b32.xlu1 %v4590_v56, %s3779_s5 }
 0x6ce   :  { %v1871_v60 = vpop.permute.xlu1 %1870 }
 0x6d2   :  { %v1869_v3 = vpop.permute.xlu1 %1868 }
 0x6d6   :  { %v1853_v43 = vpop.permute.xlu0 %1852  ;;  %v1867_v9 = vpop.permute.xlu1 %1866 }
 0x6d7   :  { %v1889_v58 = vsel %vm775_vm3, %v1835_v57, %v1853_v43  ;;  %v2218_v43 = vld [vmem:[%s4878_s17] sm:$0xff] }
 0x6da   :  { %v1877_v59 = vpop.permute.xlu0 %1876 }
 0x6db   :  { %v4596_v61 = vsel %vm1890_vm4, %v1889_v58, %v1877_v59 }
 0x6dc   :  { %1938 = vrot.lane.b32.xlu0 %v4596_v61, %s3779_s5 }
 0x6de   :  { %v1847_v63 = vpop.permute.xlu0 %1846 }
 0x6df   :  { %v1886_v0 = vsel %vm775_vm3, %v1832_v62, %v1847_v63  ;;  %v2309_v63 = vld [vmem:[%s4881_s25] sm:$0xff] }
 0x6e0   :  { %1934 = vrot.lane.b32.xlu0 %v4584_v45, %s3779_s5  ;;  %v4604_v1 = vsel %vm1890_vm4, %v1886_v0, %v1871_v60 }
 0x6e1   :  { %1967 = vmatpush1.msra.mxu0 %v4604_v1  ;;  %1932 = vrot.lane.b32.xlu1 %v4604_v1, %s3779_s5 }
 0x6e2   :  { %v1845_v4 = vpop.permute.xlu0 %1844  ;;  %1968 = vmatprep.subr.mxu0 %v4871_v33 }
 0x6e3   :  { %v1885_v5 = vsel %vm775_vm3, %v1831_v2, %v1845_v4 }
 0x6e4   :  { %v4612_v6 = vsel %vm1890_vm4, %v1885_v5, %v1869_v3 }
 0x6e5   :  { %1969 = vmatpush1.msra.mxu0 %v4612_v6  ;;  %1930 = vrot.lane.b32.xlu0 %v4612_v6, %s3779_s5 }
 0x6e6   :  { %v1843_v8 = vpop.permute.xlu0 %1842  ;;  %1970 = vmatprep.subr.mxu0 %v4871_v33 }
 0x6e7   :  { %v1884_v10 = vsel %vm775_vm3, %v1830_v7, %v1843_v8 }
 0x6e8   :  { %v4620_v11 = vsel %vm1890_vm4, %v1884_v10, %v1867_v9  ;;  %v2401_v10 = vld [vmem:[%s4883_s3] sm:$0xff] }
 0x6e9   :  { %1913 = vrot.lane.b32.xlu0 %v4596_v61, %s3780_s9  ;;  %1928 = vrot.lane.b32.xlu1 %v4620_v11, %s3779_s5 }
 0x6ea   :  { %1971 = vmatpush1.msra.mxu0 %v4620_v11 }
 0x6eb   :  { %1972 = vmatprep.subr.mxu0 %v4871_v33 }
 0x6ed   :  { %1909 = vrot.lane.b32.xlu0 %v4584_v45, %s3780_s9  ;;  %1911 = vrot.lane.b32.xlu1 %v4590_v56, %s3780_s9 }
 0x6f1   :  { %1905 = vrot.lane.b32.xlu0 %v4612_v6, %s3780_s9  ;;  %1907 = vrot.lane.b32.xlu1 %v4604_v1, %s3780_s9 }
 0x6f5   :  { %1903 = vrot.lane.b32.xlu1 %v4620_v11, %s3780_s9  ;;  %1958 = vperm.xlu0 %3691, %v1955_v16  }
 0x6f9   :  { %2048 = vperm.xlu0 %3691, %v2045_v14  }
 0x73e   :  { %v1937_v19 = vpop.permute.xlu1 %1936 }
 0x74e   :  { %v1939_v18 = vpop.permute.xlu0 %1938 }
 0x74f   :  { %3196 = vmatpush1.msk.msra.mxu0 %vm4643_vm6, %v1939_v18 }
 0x750   :  { %1974 = vmatprep.subr.mxu0 %v4871_v33 }
 0x751   :  { %3198 = vmatpush1.msk.msra.mxu0 %vm4643_vm6, %v1937_v19 }
 0x752   :  { %v1935_v20 = vpop.permute.xlu0 %1934  ;;  %1976 = vmatprep.subr.mxu0 %v4871_v33 }
 0x753   :  { %v1933_v21 = vpop.permute.xlu1 %1932  ;;  %3200 = vmatpush1.msk.msra.mxu0 %vm4643_vm6, %v1935_v20 }
 0x754   :  { %1978 = vmatprep.subr.mxu0 %v4871_v33 }
 0x755   :  { %3202 = vmatpush1.msk.msra.mxu0 %vm4643_vm6, %v1933_v21  ;;  %v2491_v21 = vld [vmem:[%s4887_s14] sm:$0xff] }
 0x756   :  { %1980 = vmatprep.subr.mxu0 %v4871_v33 }
 0x757   :  { %v1931_v22 = vpop.permute.xlu0 %1930 }
 0x758   :  { %3204 = vmatpush1.msk.msra.mxu0 %vm4643_vm6, %v1931_v22 }
 0x759   :  { %1982 = vmatprep.subr.mxu0 %v4871_v33 }
 0x75b   :  { %v1914_v23 = vpop.permute.xlu0 %1913  ;;  %v1929_v24 = vpop.permute.xlu1 %1928 }
 0x75c   :  { %3206 = vmatpush1.msk.msra.mxu0 %vm4643_vm6, %v1929_v24 }
 0x75d   :  { %1984 = vmatprep.subr.mxu0 %v4871_v33 }
 0x75e   :  { %3208 = vmatpush1.msk.msra.mxu0 %vm4662_vm8, %v1914_v23  ;;  %v2490_v23 = vld [vmem:[%s4888_s19] sm:$0xff] }
 0x75f   :  { %v1910_v29 = vpop.permute.xlu0 %1909  ;;  %v1912_v30 = vpop.permute.xlu1 %1911  ;;  %1986 = vmatprep.subr.mxu0 %v4871_v33 }
 0x760   :  { %3210 = vmatpush1.msk.msra.mxu0 %vm4662_vm8, %v1912_v30 }
 0x761   :  { %1988 = vmatprep.subr.mxu0 %v4871_v33 }
 0x762   :  { %3212 = vmatpush1.msk.msra.mxu0 %vm4662_vm8, %v1910_v29 }
 0x763   :  { %v1908_v31 = vpop.permute.xlu1 %1907  ;;  %1990 = vmatprep.subr.mxu0 %v4871_v33  ;;  %v1906_v32 = vpop.permute.xlu0 %1905 }
 0x764   :  { %3214 = vmatpush1.msk.msra.mxu0 %vm4662_vm8, %v1908_v31 }
 0x765   :  { %1992 = vmatprep.subr.mxu0 %v4871_v33 }
 0x766   :  { %3216 = vmatpush1.msk.msra.mxu0 %vm4662_vm8, %v1906_v32 }
 0x767   :  { %v1904_v34 = vpop.permute.xlu1 %1903  ;;  %1994 = vmatprep.subr.mxu0 %v4871_v33 }
 0x768   :  { %3218 = vmatpush1.msk.msra.mxu0 %vm4662_vm8, %v1904_v34 }
 0x769   :  { %2024 = vmatprep.subr.mxu0 %v4871_v33 }
 0x76a   :  { %2025 = vmatpush2.msra.mxu0 %v4596_v61 }
 0x76b   :  { %2026 = vmatprep.subr.mxu0 %v4871_v33 }
 0x76c   :  { %2027 = vmatpush2.msra.mxu0 %v4590_v56 }
 0x76d   :  { %2029 = vmatmul.mubr.f32.vlgmr.msra.gmra.mxu0 %v1953_v35  ;;  %3498 = vmatprep.subr.mxu0 %v4871_v33 }
 0x76e   :  { %3504 = vmatprep.mubr.msk.f32.mxu0 %vm3782_vm9, %v4871_v33 }
 0x770   :  { %v1959_v36 = vpop.permute.xlu0 %1958 }
 0x774   :  { %v2049_v27 = vpop.permute.xlu0 %2048 }
 0x82d   :  { %v2030_v37 = vpop.f32.mrf.mxu0 }
 0x82e   :  { %v2031_v28 = vadd.f32 %v2030_v37, %v1959_v36  ;;  %v2583_v36 = vld [vmem:[%s4889_s24] sm:$0xff] }
 0x82f   :  { %v2032_v13 = vpop.f32.mrf.mxu0 }
 0x830   :  { %v2034_v40 = vmax.f32 %v2031_v28, 0.0  ;;  %v2582_v13 = vld [vmem:[%s4890_s30] sm:$0xff] }
 0x832   :  { %2040 = vrot.lane.b32.xlu1 %v2034_v40, %s3779_s5  ;;  %3499 = vmatpush3.msra.mxu0 %v2034_v40 }
 0x833   :  { %3500 = vmatprep.subr.mxu0 %v4871_v33 }
 0x836   :  { %2036 = vrot.lane.b32.xlu1 %v2034_v40, %s3780_s9 }
 0x83a   :  { %2130 = vperm.xlu1 %3692, %v2127_v53  }
 0x8a4   :  { %v2041_v42 = vpop.permute.xlu1 %2040 }
 0x8a5   :  { %3501 = vmatpush3.msk.msra.mxu0 %vm4643_vm6, %v2041_v42 }
 0x8a6   :  { %3502 = vmatprep.subr.mxu0 %v4871_v33 }
 0x8a8   :  { %v2037_v47 = vpop.permute.xlu1 %2036 }
 0x8a9   :  { %3503 = vmatpush3.msk.msra.mxu0 %vm4662_vm8, %v2037_v47 }
 0x8aa   :  { %3505 = vmatmul.mubr.msk.f32.vlgmr.msra.gmra.mxu0 %vm2051_vm10, %v2044_v41  ;;  %3507 = vmatprep.subr.mxu0 %v4871_v33 }
 0x8ab   :  { %3508 = vmatpush3.msra.mxu0 %v4596_v61  ;;  %3519 = vmatprep.mubr.msk.f32.mxu0 %vm3782_vm9, %v4871_v33 }
 0x8ac   :  { %3509 = vmatprep.subr.mxu0 %v4871_v33 }
 0x8ad   :  { %3510 = vmatpush3.msra.mxu0 %v4590_v56 }
 0x8ae   :  { %3511 = vmatprep.subr.mxu0 %v4871_v33 }
 0x8af   :  { %3512 = vmatpush3.msra.mxu0 %v4584_v45 }
 0x8b0   :  { %3513 = vmatprep.subr.mxu0 %v4871_v33 }
 0x8b1   :  { %3514 = vmatpush3.msra.mxu0 %v4604_v1  ;;  %v2308_v1 = vld [vmem:[%s4882_s29] sm:$0xff] }
 0x8b2   :  { %3515 = vmatprep.subr.mxu0 %v4871_v33 }
 0x8b3   :  { %3516 = vmatpush3.msra.mxu0 %v4612_v6 }
 0x8b4   :  { %3517 = vmatprep.subr.mxu0 %v4871_v33 }
 0x8b5   :  { %3518 = vmatpush3.msra.mxu0 %v4620_v11  ;;  %v2131_v50 = vpop.permute.xlu1 %2130 }
 0x8b6   :  { %3520 = vmatmul.mubr.msk.f32.vlgmr.msra.gmra.mxu0 %vm2133_vm11, %v2126_v38  ;;  %3522 = vmatprep.subr.mxu0 %v4871_v33 }
 0x8b7   :  { %3528 = vmatprep.mubr.msk.f32.mxu0 %vm3782_vm9, %v4871_v33 }
 0x96a   :  { %v2121_v51 = vpop.f32.mrf.mxu0 }
 0x96b   :  { %v2122_v26 = vadd.f32 %v2121_v51, %v2049_v27  ;;  %v2673_v51 = vld [vmem:[%s4893_s6] sm:$0xff] }
 0x96c   :  { %v3506_v52 = vpop.f32.mrf.mxu0  ;;  %v2672_v27 = vld [vmem:[%s4894_s20] sm:$0xff] }
 0x96d   :  { %v2125_v46 = vmax.f32 %v2122_v26, 0.0 }
 0x976   :  { %v2203_v39 = vpop.f32.mrf.mxu0 }
 0x977   :  { %v2204_v49 = vadd.f32 %v2203_v39, %v2131_v50  ;;  %v2757_v50 = vld [vmem:[%s4895_s11 + $0x10] sm:$0xff]  ;;  %v2756_v39 = vld [vmem:[%s4895_s11 + $0x8] sm:$0xff] }
 0x978   :  { %v3521_v45 = vpop.f32.mrf.mxu0 }
 0x979   :  { %v2207_v48 = vadd.f32 %v2204_v49, %v2125_v46  ;;  %v2755_v46 = vld [vmem:[%s4895_s11] sm:$0xff] }
 0x97b   :  { %v2208_v44 = vmax.f32 %v2207_v48, 0.0 }
 0x97d   :  { %2210 = vrot.lane.b32.xlu1 %v2208_v44, %s3783_s21  ;;  %2214 = vrot.lane.b32.xlu0 %v2208_v44, %s3780_s9 }
 0x97e   :  { %3523 = vmatpush3.msra.mxu0 %v2208_v44 }
 0x97f   :  { %3524 = vmatprep.subr.mxu0 %v4871_v33 }
 0x981   :  { %2222 = vperm.xlu0 %3691, %v2219_v54  }
 0x9ef   :  { %v2215_v55 = vpop.permute.xlu0 %2214  ;;  %v2211_v57 = vpop.permute.xlu1 %2210 }
 0x9f0   :  { %3525 = vmatpush3.msk.msra.mxu0 %vm4662_vm8, %v2215_v55 }
 0x9f1   :  { %3526 = vmatprep.subr.mxu0 %v4871_v33 }
 0x9f2   :  { %3527 = vmatpush3.msk.msra.mxu0 %vm4728_vm12, %v2211_v57  ;;  %v2840_v57 = vld [vmem:[%s4896_s15 + $0x8] sm:$0xff] }
 0x9f3   :  { %3529 = vmatmul.mubr.msk.f32.vlgmr.msra.gmra.mxu0 %vm2051_vm10, %v2218_v43  ;;  %3531 = vmatprep.subr.mxu0 %v4871_v33  ;;  %v2841_v43 = vld [vmem:[%s4896_s15 + $0x10] sm:$0xff] }
 0x9f4   :  { %3537 = vmatprep.mubr.msk.f32.mxu0 %vm3782_vm9, %v4871_v33 }
 0x9fc   :  { %v2223_v58 = vpop.permute.xlu0 %2222 }
 0xab3   :  { %v2294_v59 = vpop.f32.mrf.mxu0 }
 0xab4   :  { %v2295_v60 = vadd.f32 %v2294_v59, %v2223_v58  ;;  %v2839_v58 = vld [vmem:[%s4896_s15] sm:$0xff] }
 0xab5   :  { %v3530_v61 = vpop.f32.mrf.mxu0  ;;  %v3256_v59 = vld [vmem:[%s4897_s16] ss:$0 sm:$0xff] }
 0xab6   :  { %v2298_v62 = vmax.f32 %v2295_v60, 0.0 }
 0xab8   :  { %2300 = vrot.lane.b32.xlu0 %v2298_v62, %s3783_s21  ;;  %2304 = vrot.lane.b32.xlu1 %v2298_v62, %s3780_s9 }
 0xab9   :  { %3532 = vmatpush3.msra.mxu0 %v2298_v62 }
 0xaba   :  { %3533 = vmatprep.subr.mxu0 %v4871_v33 }
 0xabc   :  { %2312 = vperm.xlu1 %3692, %v2309_v63  }
 0xb2a   :  { %v2305_v0 = vpop.permute.xlu1 %2304  ;;  %v2301_v2 = vpop.permute.xlu0 %2300 }
 0xb2b   :  { %3534 = vmatpush3.msk.msra.mxu0 %vm4662_vm8, %v2305_v0  ;;  %v2924_v0 = vld [vmem:[%s3942_s12 + $0x8] sm:$0xf] }
 0xb2c   :  { %3535 = vmatprep.subr.mxu0 %v4871_v33 }
 0xb2d   :  { %3536 = vmatpush3.msk.msra.mxu0 %vm4728_vm12, %v2301_v2  ;;  %v3258_v2 = vld [vmem:[%s3937_s4] ss:$0 sm:$0xff] }
 0xb2e   :  { %3538 = vmatmul.mubr.msk.f32.vlgmr.msra.gmra.mxu0 %vm2051_vm10, %v2308_v1  ;;  %3540 = vmatprep.subr.mxu0 %v4871_v33  ;;  %v2923_v1 = vld [vmem:[%s3942_s12] sm:$0xff] }
 0xb2f   :  { %3546 = vmatprep.mubr.msk.f32.mxu0 %vm3782_vm9, %v4871_v33 }
 0xb37   :  { %v2313_v3 = vpop.permute.xlu1 %2312 }
 0xbee   :  { %v2384_v4 = vpop.f32.mrf.mxu0 }
 0xbef   :  { %v2385_v5 = vadd.f32 %v2384_v4, %v2313_v3 }
 0xbf0   :  { %v3539_v6 = vpop.f32.mrf.mxu0 }
 0xbf1   :  { %v2388_v7 = vmax.f32 %v2385_v5, 0.0 }
 0xbf3   :  { %v2389_v8 = vadd.f32 %v2388_v7, %v2208_v44  ;;  %v3260_v7 = vld [vmem:[#allocation3] ss:$0 sm:$0xff] }
 0xbf5   :  { %v2390_v9 = vmax.f32 %v2389_v8, 0.0 }
 0xbf7   :  { %2392 = vrot.lane.b32.xlu1 %v2390_v9, %s3778_s0  ;;  %2396 = vrot.lane.b32.xlu0 %v2390_v9, %s3783_s21 }
 0xbf8   :  { %3541 = vmatpush3.msra.mxu0 %v2390_v9 }
 0xbf9   :  { %3542 = vmatprep.subr.mxu0 %v4871_v33 }
 0xbfb   :  { %2404 = vperm.xlu0 %3691, %v2401_v10  }
 0xc69   :  { %v2397_v11 = vpop.permute.xlu0 %2396  ;;  %v2393_v16 = vpop.permute.xlu1 %2392 }
 0xc6a   :  { %3543 = vmatpush3.msk.msra.mxu0 %vm4728_vm12, %v2397_v11 }
 0xc6b   :  { %3544 = vmatprep.subr.mxu0 %v4871_v33 }
 0xc6c   :  { %3545 = vmatpush3.msk.msra.mxu0 %vm4761_vm13, %v2393_v16 }
 0xc6d   :  { %3547 = vmatmul.mubr.msk.f32.vlgmr.msra.gmra.mxu0 %vm2051_vm10, %v2400_v15  ;;  %3549 = vmatprep.subr.mxu0 %v4871_v33 }
 0xc6e   :  { %3555 = vmatprep.mubr.msk.f32.mxu0 %vm3782_vm9, %v4871_v33 }
 0xc76   :  { %v2405_v14 = vpop.permute.xlu0 %2404 }
 0xd2d   :  { %v2476_v17 = vpop.f32.mrf.mxu0 }
 0xd2e   :  { %v2477_v18 = vadd.f32 %v2476_v17, %v2405_v14 }
 0xd2f   :  { %v3548_v19 = vpop.f32.mrf.mxu0 }
 0xd30   :  { %v2480_v20 = vmax.f32 %v2477_v18, 0.0 }
 0xd32   :  { %2482 = vrot.lane.b32.xlu0 %v2480_v20, %s3778_s0  ;;  %2486 = vrot.lane.b32.xlu1 %v2480_v20, %s3783_s21 }
 0xd33   :  { %3550 = vmatpush3.msra.mxu0 %v2480_v20 }
 0xd34   :  { %3551 = vmatprep.subr.mxu0 %v4871_v33 }
 0xd36   :  { %2494 = vperm.xlu1 %3692, %v2491_v21  }
 0xda4   :  { %v2487_v22 = vpop.permute.xlu1 %2486  ;;  %v2483_v24 = vpop.permute.xlu0 %2482 }
 0xda5   :  { %3552 = vmatpush3.msk.msra.mxu0 %vm4728_vm12, %v2487_v22 }
 0xda6   :  { %3553 = vmatprep.subr.mxu0 %v4871_v33 }
 0xda7   :  { %3554 = vmatpush3.msk.msra.mxu0 %vm4761_vm13, %v2483_v24 }
 0xda8   :  { %3556 = vmatmul.mubr.msk.f32.vlgmr.msra.gmra.mxu0 %vm2051_vm10, %v2490_v23  ;;  %3558 = vmatprep.subr.mxu0 %v4871_v33 }
 0xda9   :  { %3564 = vmatprep.mubr.msk.f32.mxu0 %vm3782_vm9, %v4871_v33 }
 0xdb1   :  { %v2495_v25 = vpop.permute.xlu1 %2494 }
 0xe68   :  { %v2566_v29 = vpop.f32.mrf.mxu0 }
 0xe69   :  { %v2567_v30 = vadd.f32 %v2566_v29, %v2495_v25 }
 0xe6a   :  { %v3557_v31 = vpop.f32.mrf.mxu0 }
 0xe6b   :  { %v2570_v32 = vmax.f32 %v2567_v30, 0.0 }
 0xe6d   :  { %v2571_v34 = vadd.f32 %v2570_v32, %v2390_v9 }
 0xe6f   :  { %v2572_v35 = vmax.f32 %v2571_v34, 0.0 }
 0xe71   :  { %2574 = vrot.lane.b32.xlu1 %v2572_v35, %s3776_s10  ;;  %2578 = vrot.lane.b32.xlu0 %v2572_v35, %s3778_s0 }
 0xe72   :  { %3559 = vmatpush3.msra.mxu0 %v2572_v35 }
 0xe73   :  { %3560 = vmatprep.subr.mxu0 %v4871_v33 }
 0xe75   :  { %2586 = vperm.xlu0 %3691, %v2583_v36  }
 0xee3   :  { %v2579_v37 = vpop.permute.xlu0 %2578  ;;  %v2575_v40 = vpop.permute.xlu1 %2574 }
 0xee4   :  { %3561 = vmatpush3.msk.msra.mxu0 %vm4761_vm13, %v2579_v37 }
 0xee5   :  { %3562 = vmatprep.subr.mxu0 %v4871_v33 }
 0xee6   :  { %3563 = vmatpush3.msk.msra.mxu0 %vm4794_vm14, %v2575_v40 }
 0xee7   :  { %3565 = vmatmul.mubr.msk.f32.vlgmr.msra.gmra.mxu0 %vm2051_vm10, %v2582_v13  ;;  %3567 = vmatprep.subr.mxu0 %v4871_v33 }
 0xee8   :  { %3573 = vmatprep.mubr.msk.f32.mxu0 %vm3782_vm9, %v4871_v33 }
 0xef0   :  { %v2587_v53 = vpop.permute.xlu0 %2586 }
 0xfa7   :  { %v2658_v42 = vpop.f32.mrf.mxu0 }
 0xfa8   :  { %v2659_v41 = vadd.f32 %v2658_v42, %v2587_v53 }
 0xfa9   :  { %v3566_v47 = vpop.f32.mrf.mxu0 }
 0xfaa   :  { %v2662_v38 = vmax.f32 %v2659_v41, 0.0 }
 0xfac   :  { %2664 = vrot.lane.b32.xlu0 %v2662_v38, %s3776_s10  ;;  %2668 = vrot.lane.b32.xlu1 %v2662_v38, %s3778_s0 }
 0xfad   :  { %3568 = vmatpush3.msra.mxu0 %v2662_v38 }
 0xfae   :  { %3569 = vmatprep.subr.mxu0 %v4871_v33 }
 0xfb0   :  { %2676 = vperm.xlu1 %3692, %v2673_v51  }
0x101e   :  { %v2669_v52 = vpop.permute.xlu1 %2668  ;;  %v2665_v26 = vpop.permute.xlu0 %2664 }
0x101f   :  { %3570 = vmatpush3.msk.msra.mxu0 %vm4761_vm13, %v2669_v52 }
0x1020   :  { %3571 = vmatprep.subr.mxu0 %v4871_v33 }
0x1021   :  { %3572 = vmatpush3.msk.msra.mxu0 %vm4794_vm14, %v2665_v26 }
0x1022   :  { %3574 = vmatmul.mubr.msk.f32.vlgmr.msra.gmra.mxu0 %vm2051_vm10, %v2672_v27  ;;  %3576 = vmatprep.subr.mxu0 %v4871_v33 }
0x1023   :  { %3582 = vmatprep.mubr.msk.f32.mxu0 %vm3782_vm9, %v4871_v33  ;;  %3577 = vmatpush3.msra.mxu0 %v2757_v50 }
0x1024   :  { %3578 = vmatprep.subr.mxu0 %v4871_v33 }
0x1025   :  { %3579 = vmatpush3.msra.mxu0 %v2756_v39 }
0x1026   :  { %3580 = vmatprep.subr.mxu0 %v4871_v33 }
0x1027   :  { %3581 = vmatpush3.msra.mxu0 %v2755_v46 }
0x1028   :  { %3585 = vmatprep.subr.mxu0 %v4871_v33 }
0x102b   :  { %v2677_v49 = vpop.permute.xlu1 %2676 }
0x10e2   :  { %v2748_v45 = vpop.f32.mrf.mxu0 }
0x10e3   :  { %v2749_v48 = vadd.f32 %v2748_v45, %v2677_v49 }
0x10e4   :  { %v3575_v44 = vpop.f32.mrf.mxu0 }
0x10e5   :  { %v2752_v54 = vmax.f32 %v2749_v48, 0.0 }
0x10e7   :  { %v2753_v55 = vadd.f32 %v2752_v54, %v2572_v35 }
0x10e9   :  { %v2754_v56 = vmax.f32 %v2753_v55, 0.0 }
0x10eb   :  { %3583 = vmatmul.mubr.msk.f32.vlgmr.msra.gmra.mxu0 %vm2051_vm10, %v2754_v56 }
0x10ec   :  { %3591 = vmatprep.mubr.msk.f32.mxu0 %vm3782_vm9, %v4871_v33  ;;  %3586 = vmatpush3.msra.mxu0 %v2841_v43 }
0x10ed   :  { %3587 = vmatprep.subr.mxu0 %v4871_v33 }
0x10ee   :  { %3588 = vmatpush3.msra.mxu0 %v2840_v57 }
0x10ef   :  { %3589 = vmatprep.subr.mxu0 %v4871_v33 }
0x10f0   :  { %3590 = vmatpush3.msra.mxu0 %v2839_v58 }
0x10f1   :  { %3594 = vmatprep.subr.mxu0 %v4871_v33 }
0x11ab   :  { %v2834_v60 = vpop.f32.mrf.mxu0 }
0x11ac   :  { %v2835_v61 = vadd.f32 %v3256_v59, %v2834_v60 }
0x11ad   :  { %v3584_v62 = vpop.f32.mrf.mxu0 }
0x11ae   :  { %v2838_v63 = vmax.f32 %v2835_v61, 0.0 }
0x11b0   :  { %3592 = vmatmul.mubr.msk.f32.vlgmr.msra.gmra.mxu0 %vm2051_vm10, %v2838_v63 }
0x11b1   :  { %3598 = vmatprep.mubr.msk.f32.mxu0 %vm3782_vm9, %v4871_v33  ;;  %3595 = vmatpush3.msk.msra.mxu0 %vm296_vm0, %v2924_v0 }
0x11b2   :  { %3596 = vmatprep.subr.mxu0 %v4871_v33 }
0x11b3   :  { %3597 = vmatpush3.msra.mxu0 %v2923_v1 }
0x1270   :  { %v2918_v3 = vpop.f32.mrf.mxu0 }
0x1271   :  { %v2919_v4 = vadd.f32 %v3258_v2, %v2918_v3 }
0x1272   :  { %v3593_v5 = vpop.f32.mrf.mxu0 }
0x1273   :  { %v2922_v6 = vmax.f32 %v2919_v4, 0.0 }
0x1275   :  { %3599 = vmatmul.mubr.msk.f32.vlgmr.msra.gmra.mxu0 %vm2932_vm15, %v2922_v6 }
0x1335   :  { %v3005_v8 = vpop.f32.mrf.mxu0 }
0x1336   :  { %v3006_v9 = vadd.f32 %v3260_v7, %v3005_v8 }
0x1337   :  { %v3600_v10 = vpop.f32.mrf.mxu0 }
0x1338   :  { %3009 = vst.msk [vmem:[%s3950_s27] sm:$0xff] %vm1946_vm5, %v3006_v9 }
0x1339   :  { %3014 = vsyncpa [#allocation5], 1 }

</bundles_post_ra>
